<compile_context>
chip_gen: v6e
topology: v6e:2x2x1
jax: 0.10.0
libtpu: 0.0.40
codegen_flags: <defaults>
</compile_context>

<pallas_src>
import functools

import numpy as np

import jax
import jax.numpy as jnp
from jax.experimental import pallas as pl
from jax.experimental.pallas import tpu as pltpu

_VMEM_LIMIT_BYTES = 32 * 1024 * 1024  # safe on v5e/v6e/v7x scoped VMEM


def _round_up(x, m):
    return ((x + m - 1) // m) * m


def _cdiv(a, b):
    return -(-a // b)


# ----------------------------------------------------------------------------
# Kernel 1: fused pre-conv(3x3, pad=1) + BN(eval) + SiLU + mean over height.
# Input block is (H, TF, 3*Kp): frame axis on sublanes, K on lanes. One MXU
# matmul per output row against a block-Toeplitz weight (BN scale pre-folded),
# H reduction accumulated in registers, single bf16 store per tile.
# ----------------------------------------------------------------------------
def _pre_stmap_kernel(x_ref, t_ref, shift_ref, o_ref, *, h_out, inv_h):
    tf, wc = o_ref.shape
    t = t_ref[...]                                             # (3*Kp, WC) bf16
    shift = jnp.broadcast_to(shift_ref[...], (tf, wc))         # hoisted once

    def step(h, acc):
        z = jnp.dot(x_ref[h], t, preferred_element_type=jnp.float32) + shift
        y = z * pl.reciprocal(1.0 + jnp.exp(-z), approx=True)  # SiLU (EUP recip)
        return acc + y

    acc = jnp.zeros((tf, wc), jnp.float32)
    if h_out <= 32:                       # static H: fully unrolled at trace time
        for h in range(h_out):
            acc = step(h, acc)
    else:
        acc = jax.lax.fori_loop(0, h_out, step, acc)

    o_ref[...] = (acc * inv_h).astype(o_ref.dtype)             # deferred mean scale


def pre_conv_stmap(frames, p, eps=1e-5):
    """frames: [BS, H, W, Cin] f32 -> STMap rows [BS, W*16] bf16 (lane-dense)."""
    BS, H, W, Cin = frames.shape
    w = p["w"]                                    # [Cout, Cin, 3, 3] torch layout
    Cout = w.shape[0]
    s = p["gamma"] / jnp.sqrt(p["var"] + eps)     # BN scale (eval mode)
    shift = (p["b"] - p["mean"]) * s + p["beta"]  # conv bias folded into BN

    Kp = (W + 2) * Cin
    K = 3 * Kp
    WC = W * Cout

    # Block-Toeplitz weight, kh-major along K:
    #   T[kh*Kp + wp*Cin + ci, w*Cout + co] = w[co, ci, kh, wp - w] * s[co]
    ind = np.zeros((3, W + 2, W), np.float32)
    for kw in range(3):
        for wi in range(W):
            ind[kw, wi + kw, wi] = 1.0
    ind = jnp.asarray(ind)
    w_s = jnp.transpose(w, (2, 3, 1, 0)) * s[None, None, None, :]   # (kh,kw,ci,co)
    T = jnp.einsum("kpw,hkio->hpiwo", ind, w_s).reshape(K, WC).astype(jnp.bfloat16)
    shift_full = jnp.tile(shift, W).reshape(1, WC).astype(jnp.float32)

    # Zero-pad, flatten (W+2, Cin) into the lane dim, H-im2col (3 halo'd rows
    # concatenated along K), then put the frame axis on sublanes: [H, BS, K].
    xpad = jnp.pad(frames.astype(jnp.bfloat16), ((0, 0), (1, 1), (1, 1), (0, 0)))
    xrow = xpad.reshape(BS, H + 2, Kp)
    xcat = jnp.concatenate(
        [xrow[:, 0:H], xrow[:, 1:H + 1], xrow[:, 2:H + 2]], axis=-1)   # [BS, H, K]
    xcat = jnp.transpose(xcat, (1, 0, 2))                              # [H, BS, K]

    # Frame-tile selection: 16-aligned (bf16 sublane packing), >=2 programs on
    # the parallel axis when there is enough work (v7x: 2 TensorCores), and a
    # conservative per-block VMEM budget for large H.
    n_tiles = max(1, _cdiv(BS, 256))
    if BS > 16:
        n_tiles = max(n_tiles, 2)
    TF = _round_up(_cdiv(BS, n_tiles), 16)
    tf_budget = max(16, ((8 * 1024 * 1024) // max(1, H * K * 2)) // 16 * 16)
    TF = min(TF, tf_budget)
    BSp = _round_up(BS, TF)
    if BSp > BS:
        xcat = jnp.pad(xcat, ((0, 0), (0, BSp - BS), (0, 0)))

    kernel = functools.partial(_pre_stmap_kernel, h_out=H, inv_h=1.0 / H)
    stmap = pl.pallas_call(
        kernel,
        grid=(BSp // TF,),
        out_shape=jax.ShapeDtypeStruct((BSp, WC), jnp.bfloat16),
        in_specs=[
            pl.BlockSpec((H, TF, K), lambda i: (0, i, 0)),   # halo'd frame rows
            pl.BlockSpec((K, WC), lambda i: (0, 0)),         # Toeplitz weights
            pl.BlockSpec((1, WC), lambda i: (0, 0)),         # BN/bias shift
        ],
        out_specs=pl.BlockSpec((TF, WC), lambda i: (i, 0)),
        compiler_params=pltpu.CompilerParams(
            dimension_semantics=("parallel",),
            vmem_limit_bytes=_VMEM_LIMIT_BYTES,
        ),
    )(xcat, T, shift_full)
    return stmap[:BS]


# ----------------------------------------------------------------------------
# Kernel 2: row-tiled (im2col @ weight) + shift + SiLU for the small layers.
# BN scale folded into the weight columns on the host; exact-Cout output.
# ----------------------------------------------------------------------------
def _matmul_shift_silu_kernel(p_ref, w_ref, shift_ref, o_ref, *, approx):
    z = jnp.dot(p_ref[...], w_ref[...], preferred_element_type=jnp.float32)
    z = z + shift_ref[...]
    if approx:
        sig = pl.reciprocal(1.0 + jnp.exp(-z), approx=True)   # SiLU (EUP recip)
    else:
        sig = 1.0 / (1.0 + jnp.exp(-z))                        # exact (last layer)
    o_ref[...] = (z * sig).astype(o_ref.dtype)


def _extract_patches(x, stride):
    """x: [B, H, W, C] NHWC, 3x3 kernel, pad=1 -> ([B*Ho*Wo, 9*C] bf16, Ho, Wo)."""
    B, H, W, C = x.shape
    xp = jnp.pad(x.astype(jnp.bfloat16), ((0, 0), (1, 1), (1, 1), (0, 0)))
    Ho = (H + 2 - 3) // stride + 1
    Wo = (W + 2 - 3) // stride + 1
    pats = []
    for kh in range(3):
        for kw in range(3):
            sl = xp[:, kh: kh + stride * (Ho - 1) + 1: stride,
                       kw: kw + stride * (Wo - 1) + 1: stride, :]
            pats.append(sl)
    p = jnp.stack(pats, axis=3)                  # [B, Ho, Wo, 9, C] (kh*3+kw, c)
    return p.reshape(B * Ho * Wo, 9 * C), Ho, Wo


def conv3x3_bn_silu(x, p, stride, eps=1e-5, out_dtype=jnp.bfloat16, approx=True):
    """x: [B, H, W, Cin] NHWC. Conv2d(3x3, pad=1) + BatchNorm(eval) + SiLU."""
    B, H, W, Cin = x.shape
    w = p["w"]
    Cout = w.shape[0]
    K = 9 * Cin
    # TODO(synk): for the larger layers, halo'd row views (kernel-1 style) would
    # avoid materializing the 9x im2col patches tensor in HBM.
    patches, Ho, Wo = _extract_patches(x, stride)           # [M, K] bf16
    M = patches.shape[0]

    s = p["gamma"] / jnp.sqrt(p["var"] + eps)
    shift = (p["b"] - p["mean"]) * s + p["beta"]
    w2 = (jnp.transpose(w, (2, 3, 1, 0)).reshape(K, Cout) * s[None, :]
          ).astype(jnp.bfloat16)                            # BN scale folded in
    shiftp = shift.reshape(1, Cout).astype(jnp.float32)

    # 16-aligned row tiles; >=2 parallel programs when feasible (v7x: 2 TCs).
    n_tiles = max(1, _cdiv(M, 512))
    if M > 16:
        n_tiles = max(n_tiles, 2)
    TM = _round_up(_cdiv(M, n_tiles), 16)
    Mp = _round_up(M, TM)
    if Mp > M:
        patches = jnp.pad(patches, ((0, Mp - M), (0, 0)))

    kernel = functools.partial(_matmul_shift_silu_kernel, approx=approx)
    out = pl.pallas_call(
        kernel,
        grid=(Mp // TM,),
        out_shape=jax.ShapeDtypeStruct((Mp, Cout), out_dtype),
        in_specs=[
            pl.BlockSpec((TM, K), lambda i: (i, 0)),
            pl.BlockSpec((K, Cout), lambda i: (0, 0)),
            pl.BlockSpec((1, Cout), lambda i: (0, 0)),
        ],
        out_specs=pl.BlockSpec((TM, Cout), lambda i: (i, 0)),
        compiler_params=pltpu.CompilerParams(
            dimension_semantics=("parallel",),
            vmem_limit_bytes=_VMEM_LIMIT_BYTES,
        ),
    )(patches, w2, shiftp)
    return out[:M].reshape(B, Ho, Wo, Cout)


# ----------------------------------------------------------------------------
# JAX glue: pooling, parameter setup, forward pass
# ----------------------------------------------------------------------------
def avgpool2x2(x):
    """NHWC 2x2 avg pool, stride 2 (tiny glue op, floor behavior like PyTorch)."""
    B, H, W, C = x.shape
    x = x[:, : (H // 2) * 2, : (W // 2) * 2, :].astype(jnp.float32)
    out = x.reshape(B, H // 2, 2, W // 2, 2, C).mean(axis=(2, 4))
    return out.astype(jnp.bfloat16)


def init_params(key, in_channels, feature_dim):
    defs = [
        ("pre", in_channels, 16),
        ("c1", 16, 32),
        ("c2", 32, 64),
        ("c3", 64, 128),
        ("c4", 128, feature_dim),
    ]
    params = {}
    for name, cin, cout in defs:
        key, k1, k2, k3, k4, k5, k6 = jax.random.split(key, 7)
        params[name] = dict(
            w=jax.random.normal(k1, (cout, cin, 3, 3), jnp.float32)
              * (1.0 / (3.0 * float(cin) ** 0.5)),
            b=jax.random.normal(k2, (cout,), jnp.float32) * 0.05,
            gamma=jax.random.uniform(k3, (cout,), jnp.float32, 0.8, 1.2),
            beta=jax.random.normal(k4, (cout,), jnp.float32) * 0.05,
            mean=jax.random.normal(k5, (cout,), jnp.float32) * 0.05,
            var=jax.random.uniform(k6, (cout,), jnp.float32, 0.8, 1.2),
        )
    return params


def stmap_feature_extractor(x, params):
    """x: [B, S, C, H, W] (PyTorch convention) -> features [B, feature_dim]."""
    B, S, C, H, W = x.shape

    # generate_stmap: per-frame pre_conv + BN + SiLU, mean over height — fused.
    frames = jnp.transpose(x.reshape(B * S, C, H, W), (0, 2, 3, 1))       # NHWC
    stmap = pre_conv_stmap(frames, params["pre"]).reshape(B, S, W, 16)    # NHWC

    y = conv3x3_bn_silu(stmap, params["c1"], stride=2)
    y = avgpool2x2(y)
    y = conv3x3_bn_silu(y, params["c2"], stride=2)
    y = avgpool2x2(y)
    y = conv3x3_bn_silu(y, params["c3"], stride=1)
    y = conv3x3_bn_silu(y, params["c4"], stride=1, approx=False,
                        out_dtype=jnp.float32)

    feat = jnp.mean(y.astype(jnp.float32), axis=(1, 2))  # AdaptiveAvgPool + flatten
    # nn.Dropout: identity at inference (eval mode).
    return feat


if __name__ == "__main__":
    key = jax.random.PRNGKey(0)
    kx, kp = jax.random.split(key)

    B, S, C, H, W = 2, 16, 3, 8, 16
    feature_dim = 32

    x = jax.random.normal(kx, (B, S, C, H, W), jnp.float32)
    params = init_params(kp, C, feature_dim)

    fwd = jax.jit(stmap_feature_extractor)
    out = fwd(x, params)
    out = jax.block_until_ready(out)

    assert out.shape == (B, feature_dim), out.shape
    assert jnp.all(jnp.isfinite(out))
    print("KERNEL_OK")
</pallas_src>

<mosaic_0001>
module attributes {stable_mosaic.version = 11 : i64} {
  func.func @_pre_stmap_kernel(%arg0: i32, %arg1: memref<8x16x162xbf16, #tpu.memory_space<vmem>>, %arg2: memref<162x256xbf16, #tpu.memory_space<vmem>>, %arg3: memref<1x256xf32, #tpu.memory_space<vmem>>, %arg4: memref<16x256xbf16, #tpu.memory_space<vmem>>) attributes {dimension_semantics = [#tpu.dimension_semantics<parallel>], iteration_bounds = array<i64: 2>, scalar_prefetch = 0 : i64, scratch_operands = 0 : i64, tpu.core_type = #tpu.core_type<tc>, window_params = [{transform_indices = @transform_0, window_bounds = array<i64: 8, 16, 162>}, {pipeline_mode = #tpu.pipeline_mode<synchronous>, transform_indices = @transform_1, window_bounds = array<i64: 162, 256>}, {pipeline_mode = #tpu.pipeline_mode<synchronous>, transform_indices = @transform_2, window_bounds = array<i64: 1, 256>}, {transform_indices = @transform_3, window_bounds = array<i64: 16, 256>}]} {
    %c0 = arith.constant 0 : index
    %c0_0 = arith.constant 0 : index
    %0 = vector.load %arg2[%c0, %c0_0] : memref<162x256xbf16, #tpu.memory_space<vmem>>, vector<162x256xbf16>
    %c0_1 = arith.constant 0 : index
    %c0_2 = arith.constant 0 : index
    %1 = vector.load %arg3[%c0_1, %c0_2] : memref<1x256xf32, #tpu.memory_space<vmem>>, vector<1x256xf32>
    %2 = vector.shape_cast %1 : vector<1x256xf32> to vector<1x256xf32>
    %3 = vector.broadcast %2 : vector<1x256xf32> to vector<16x256xf32>
    %cst = arith.constant 0.000000e+00 : f32
    %4 = vector.broadcast %cst : f32 to vector<16x256xf32>
    %c0_3 = arith.constant 0 : index
    %c0_4 = arith.constant 0 : index
    %c0_5 = arith.constant 0 : index
    %5 = vector.load %arg1[%c0_3, %c0_4, %c0_5] : memref<8x16x162xbf16, #tpu.memory_space<vmem>>, vector<1x16x162xbf16>
    %6 = vector.shape_cast %5 : vector<1x16x162xbf16> to vector<16x162xbf16>
    %cst_6 = arith.constant dense<0.000000e+00> : vector<16x256xf32>
    %7 = tpu.matmul %6, %0, %cst_6 {dimension_numbers = #tpu.dot_dimension_numbers<[1], [0], [0], [1], [0, 0, 1, 1], [], []>} : vector<16x162xbf16>, vector<162x256xbf16>, vector<16x256xf32> -> vector<16x256xf32>
    %8 = arith.addf %7, %3 : vector<16x256xf32>
    %cst_7 = arith.constant 0.000000e+00 : f32
    %9 = vector.broadcast %cst_7 : f32 to vector<16x256xf32>
    %10 = arith.subf %9, %8 : vector<16x256xf32>
    %11 = math.exp %10 : vector<16x256xf32>
    %cst_8 = arith.constant 1.000000e+00 : f32
    %12 = vector.broadcast %cst_8 : f32 to vector<16x256xf32>
    %13 = arith.addf %12, %11 : vector<16x256xf32>
    %14 = tpu.reciprocal %13 {approx = true} : vector<16x256xf32> -> vector<16x256xf32>
    %15 = arith.mulf %8, %14 : vector<16x256xf32>
    %16 = arith.addf %4, %15 : vector<16x256xf32>
    %c1 = arith.constant 1 : index
    %c0_9 = arith.constant 0 : index
    %c0_10 = arith.constant 0 : index
    %17 = vector.load %arg1[%c1, %c0_9, %c0_10] : memref<8x16x162xbf16, #tpu.memory_space<vmem>>, vector<1x16x162xbf16>
    %18 = vector.shape_cast %17 : vector<1x16x162xbf16> to vector<16x162xbf16>
    %cst_11 = arith.constant dense<0.000000e+00> : vector<16x256xf32>
    %19 = tpu.matmul %18, %0, %cst_11 {dimension_numbers = #tpu.dot_dimension_numbers<[1], [0], [0], [1], [0, 0, 1, 1], [], []>} : vector<16x162xbf16>, vector<162x256xbf16>, vector<16x256xf32> -> vector<16x256xf32>
    %20 = arith.addf %19, %3 : vector<16x256xf32>
    %cst_12 = arith.constant 0.000000e+00 : f32
    %21 = vector.broadcast %cst_12 : f32 to vector<16x256xf32>
    %22 = arith.subf %21, %20 : vector<16x256xf32>
    %23 = math.exp %22 : vector<16x256xf32>
    %cst_13 = arith.constant 1.000000e+00 : f32
    %24 = vector.broadcast %cst_13 : f32 to vector<16x256xf32>
    %25 = arith.addf %24, %23 : vector<16x256xf32>
    %26 = tpu.reciprocal %25 {approx = true} : vector<16x256xf32> -> vector<16x256xf32>
    %27 = arith.mulf %20, %26 : vector<16x256xf32>
    %28 = arith.addf %16, %27 : vector<16x256xf32>
    %c2 = arith.constant 2 : index
    %c0_14 = arith.constant 0 : index
    %c0_15 = arith.constant 0 : index
    %29 = vector.load %arg1[%c2, %c0_14, %c0_15] : memref<8x16x162xbf16, #tpu.memory_space<vmem>>, vector<1x16x162xbf16>
    %30 = vector.shape_cast %29 : vector<1x16x162xbf16> to vector<16x162xbf16>
    %cst_16 = arith.constant dense<0.000000e+00> : vector<16x256xf32>
    %31 = tpu.matmul %30, %0, %cst_16 {dimension_numbers = #tpu.dot_dimension_numbers<[1], [0], [0], [1], [0, 0, 1, 1], [], []>} : vector<16x162xbf16>, vector<162x256xbf16>, vector<16x256xf32> -> vector<16x256xf32>
    %32 = arith.addf %31, %3 : vector<16x256xf32>
    %cst_17 = arith.constant 0.000000e+00 : f32
    %33 = vector.broadcast %cst_17 : f32 to vector<16x256xf32>
    %34 = arith.subf %33, %32 : vector<16x256xf32>
    %35 = math.exp %34 : vector<16x256xf32>
    %cst_18 = arith.constant 1.000000e+00 : f32
    %36 = vector.broadcast %cst_18 : f32 to vector<16x256xf32>
    %37 = arith.addf %36, %35 : vector<16x256xf32>
    %38 = tpu.reciprocal %37 {approx = true} : vector<16x256xf32> -> vector<16x256xf32>
    %39 = arith.mulf %32, %38 : vector<16x256xf32>
    %40 = arith.addf %28, %39 : vector<16x256xf32>
    %c3 = arith.constant 3 : index
    %c0_19 = arith.constant 0 : index
    %c0_20 = arith.constant 0 : index
    %41 = vector.load %arg1[%c3, %c0_19, %c0_20] : memref<8x16x162xbf16, #tpu.memory_space<vmem>>, vector<1x16x162xbf16>
    %42 = vector.shape_cast %41 : vector<1x16x162xbf16> to vector<16x162xbf16>
    %cst_21 = arith.constant dense<0.000000e+00> : vector<16x256xf32>
    %43 = tpu.matmul %42, %0, %cst_21 {dimension_numbers = #tpu.dot_dimension_numbers<[1], [0], [0], [1], [0, 0, 1, 1], [], []>} : vector<16x162xbf16>, vector<162x256xbf16>, vector<16x256xf32> -> vector<16x256xf32>
    %44 = arith.addf %43, %3 : vector<16x256xf32>
    %cst_22 = arith.constant 0.000000e+00 : f32
    %45 = vector.broadcast %cst_22 : f32 to vector<16x256xf32>
    %46 = arith.subf %45, %44 : vector<16x256xf32>
    %47 = math.exp %46 : vector<16x256xf32>
    %cst_23 = arith.constant 1.000000e+00 : f32
    %48 = vector.broadcast %cst_23 : f32 to vector<16x256xf32>
    %49 = arith.addf %48, %47 : vector<16x256xf32>
    %50 = tpu.reciprocal %49 {approx = true} : vector<16x256xf32> -> vector<16x256xf32>
    %51 = arith.mulf %44, %50 : vector<16x256xf32>
    %52 = arith.addf %40, %51 : vector<16x256xf32>
    %c4 = arith.constant 4 : index
    %c0_24 = arith.constant 0 : index
    %c0_25 = arith.constant 0 : index
    %53 = vector.load %arg1[%c4, %c0_24, %c0_25] : memref<8x16x162xbf16, #tpu.memory_space<vmem>>, vector<1x16x162xbf16>
    %54 = vector.shape_cast %53 : vector<1x16x162xbf16> to vector<16x162xbf16>
    %cst_26 = arith.constant dense<0.000000e+00> : vector<16x256xf32>
    %55 = tpu.matmul %54, %0, %cst_26 {dimension_numbers = #tpu.dot_dimension_numbers<[1], [0], [0], [1], [0, 0, 1, 1], [], []>} : vector<16x162xbf16>, vector<162x256xbf16>, vector<16x256xf32> -> vector<16x256xf32>
    %56 = arith.addf %55, %3 : vector<16x256xf32>
    %cst_27 = arith.constant 0.000000e+00 : f32
    %57 = vector.broadcast %cst_27 : f32 to vector<16x256xf32>
    %58 = arith.subf %57, %56 : vector<16x256xf32>
    %59 = math.exp %58 : vector<16x256xf32>
    %cst_28 = arith.constant 1.000000e+00 : f32
    %60 = vector.broadcast %cst_28 : f32 to vector<16x256xf32>
    %61 = arith.addf %60, %59 : vector<16x256xf32>
    %62 = tpu.reciprocal %61 {approx = true} : vector<16x256xf32> -> vector<16x256xf32>
    %63 = arith.mulf %56, %62 : vector<16x256xf32>
    %64 = arith.addf %52, %63 : vector<16x256xf32>
    %c5 = arith.constant 5 : index
    %c0_29 = arith.constant 0 : index
    %c0_30 = arith.constant 0 : index
    %65 = vector.load %arg1[%c5, %c0_29, %c0_30] : memref<8x16x162xbf16, #tpu.memory_space<vmem>>, vector<1x16x162xbf16>
    %66 = vector.shape_cast %65 : vector<1x16x162xbf16> to vector<16x162xbf16>
    %cst_31 = arith.constant dense<0.000000e+00> : vector<16x256xf32>
    %67 = tpu.matmul %66, %0, %cst_31 {dimension_numbers = #tpu.dot_dimension_numbers<[1], [0], [0], [1], [0, 0, 1, 1], [], []>} : vector<16x162xbf16>, vector<162x256xbf16>, vector<16x256xf32> -> vector<16x256xf32>
    %68 = arith.addf %67, %3 : vector<16x256xf32>
    %cst_32 = arith.constant 0.000000e+00 : f32
    %69 = vector.broadcast %cst_32 : f32 to vector<16x256xf32>
    %70 = arith.subf %69, %68 : vector<16x256xf32>
    %71 = math.exp %70 : vector<16x256xf32>
    %cst_33 = arith.constant 1.000000e+00 : f32
    %72 = vector.broadcast %cst_33 : f32 to vector<16x256xf32>
    %73 = arith.addf %72, %71 : vector<16x256xf32>
    %74 = tpu.reciprocal %73 {approx = true} : vector<16x256xf32> -> vector<16x256xf32>
    %75 = arith.mulf %68, %74 : vector<16x256xf32>
    %76 = arith.addf %64, %75 : vector<16x256xf32>
    %c6 = arith.constant 6 : index
    %c0_34 = arith.constant 0 : index
    %c0_35 = arith.constant 0 : index
    %77 = vector.load %arg1[%c6, %c0_34, %c0_35] : memref<8x16x162xbf16, #tpu.memory_space<vmem>>, vector<1x16x162xbf16>
    %78 = vector.shape_cast %77 : vector<1x16x162xbf16> to vector<16x162xbf16>
    %cst_36 = arith.constant dense<0.000000e+00> : vector<16x256xf32>
    %79 = tpu.matmul %78, %0, %cst_36 {dimension_numbers = #tpu.dot_dimension_numbers<[1], [0], [0], [1], [0, 0, 1, 1], [], []>} : vector<16x162xbf16>, vector<162x256xbf16>, vector<16x256xf32> -> vector<16x256xf32>
    %80 = arith.addf %79, %3 : vector<16x256xf32>
    %cst_37 = arith.constant 0.000000e+00 : f32
    %81 = vector.broadcast %cst_37 : f32 to vector<16x256xf32>
    %82 = arith.subf %81, %80 : vector<16x256xf32>
    %83 = math.exp %82 : vector<16x256xf32>
    %cst_38 = arith.constant 1.000000e+00 : f32
    %84 = vector.broadcast %cst_38 : f32 to vector<16x256xf32>
    %85 = arith.addf %84, %83 : vector<16x256xf32>
    %86 = tpu.reciprocal %85 {approx = true} : vector<16x256xf32> -> vector<16x256xf32>
    %87 = arith.mulf %80, %86 : vector<16x256xf32>
    %88 = arith.addf %76, %87 : vector<16x256xf32>
    %c7 = arith.constant 7 : index
    %c0_39 = arith.constant 0 : index
    %c0_40 = arith.constant 0 : index
    %89 = vector.load %arg1[%c7, %c0_39, %c0_40] : memref<8x16x162xbf16, #tpu.memory_space<vmem>>, vector<1x16x162xbf16>
    %90 = vector.shape_cast %89 : vector<1x16x162xbf16> to vector<16x162xbf16>
    %cst_41 = arith.constant dense<0.000000e+00> : vector<16x256xf32>
    %91 = tpu.matmul %90, %0, %cst_41 {dimension_numbers = #tpu.dot_dimension_numbers<[1], [0], [0], [1], [0, 0, 1, 1], [], []>} : vector<16x162xbf16>, vector<162x256xbf16>, vector<16x256xf32> -> vector<16x256xf32>
    %92 = arith.addf %91, %3 : vector<16x256xf32>
    %cst_42 = arith.constant 0.000000e+00 : f32
    %93 = vector.broadcast %cst_42 : f32 to vector<16x256xf32>
    %94 = arith.subf %93, %92 : vector<16x256xf32>
    %95 = math.exp %94 : vector<16x256xf32>
    %cst_43 = arith.constant 1.000000e+00 : f32
    %96 = vector.broadcast %cst_43 : f32 to vector<16x256xf32>
    %97 = arith.addf %96, %95 : vector<16x256xf32>
    %98 = tpu.reciprocal %97 {approx = true} : vector<16x256xf32> -> vector<16x256xf32>
    %99 = arith.mulf %92, %98 : vector<16x256xf32>
    %100 = arith.addf %88, %99 : vector<16x256xf32>
    %cst_44 = arith.constant 1.250000e-01 : f32
    %101 = vector.broadcast %cst_44 : f32 to vector<16x256xf32>
    %102 = arith.mulf %100, %101 : vector<16x256xf32>
    %103 = arith.truncf %102 : vector<16x256xf32> to vector<16x256xbf16>
    %c0_45 = arith.constant 0 : index
    %c0_46 = arith.constant 0 : index
    %104 = vector.load %arg4[%c0_45, %c0_46] : memref<16x256xbf16, #tpu.memory_space<vmem>>, vector<16x256xbf16>
    tpu.vector_store %arg4[%c0_45, %c0_46], %103 {strides = array<i32>} : memref<16x256xbf16, #tpu.memory_space<vmem>>, vector<16x256xbf16>,
    return
  }
  func.func @transform_0(%arg0: i32) -> (i32, i32, i32) {
    %c0_i32 = arith.constant 0 : i32
    %c0_i32_0 = arith.constant 0 : i32
    %c0_i32_1 = arith.constant 0 : i32
    return %c0_i32, %arg0, %c0_i32_0 : i32, i32, i32
  }
  func.func @transform_1(%arg0: i32) -> (i32, i32) {
    %c0_i32 = arith.constant 0 : i32
    %c0_i32_0 = arith.constant 0 : i32
    %c0_i32_1 = arith.constant 0 : i32
    return %c0_i32, %c0_i32_0 : i32, i32
  }
  func.func @transform_2(%arg0: i32) -> (i32, i32) {
    %c0_i32 = arith.constant 0 : i32
    %c0_i32_0 = arith.constant 0 : i32
    %c0_i32_1 = arith.constant 0 : i32
    return %c0_i32, %c0_i32_0 : i32, i32
  }
  func.func @transform_3(%arg0: i32) -> (i32, i32) {
    %c0_i32 = arith.constant 0 : i32
    %c0_i32_0 = arith.constant 0 : i32
    return %arg0, %c0_i32 : i32, i32
  }
}

module attributes {stable_mosaic.version = 11 : i64} {
  func.func @_matmul_shift_silu_kernel(%arg0: i32, %arg1: memref<64x144xbf16, #tpu.memory_space<vmem>>, %arg2: memref<144x32xbf16, #tpu.memory_space<vmem>>, %arg3: memref<1x32xf32, #tpu.memory_space<vmem>>, %arg4: memref<64x32xbf16, #tpu.memory_space<vmem>>) attributes {dimension_semantics = [#tpu.dimension_semantics<parallel>], iteration_bounds = array<i64: 2>, scalar_prefetch = 0 : i64, scratch_operands = 0 : i64, tpu.core_type = #tpu.core_type<tc>, window_params = [{transform_indices = @transform_0, window_bounds = array<i64: 64, 144>}, {pipeline_mode = #tpu.pipeline_mode<synchronous>, transform_indices = @transform_1, window_bounds = array<i64: 144, 32>}, {pipeline_mode = #tpu.pipeline_mode<synchronous>, transform_indices = @transform_2, window_bounds = array<i64: 1, 32>}, {transform_indices = @transform_3, window_bounds = array<i64: 64, 32>}]} {
    %c0 = arith.constant 0 : index
    %c0_0 = arith.constant 0 : index
    %0 = vector.load %arg1[%c0, %c0_0] : memref<64x144xbf16, #tpu.memory_space<vmem>>, vector<64x144xbf16>
    %c0_1 = arith.constant 0 : index
    %c0_2 = arith.constant 0 : index
    %1 = vector.load %arg2[%c0_1, %c0_2] : memref<144x32xbf16, #tpu.memory_space<vmem>>, vector<144x32xbf16>
    %cst = arith.constant dense<0.000000e+00> : vector<64x32xf32>
    %2 = tpu.matmul %0, %1, %cst {dimension_numbers = #tpu.dot_dimension_numbers<[1], [0], [0], [1], [0, 0, 1, 1], [], []>} : vector<64x144xbf16>, vector<144x32xbf16>, vector<64x32xf32> -> vector<64x32xf32>
    %c0_3 = arith.constant 0 : index
    %c0_4 = arith.constant 0 : index
    %3 = vector.load %arg3[%c0_3, %c0_4] : memref<1x32xf32, #tpu.memory_space<vmem>>, vector<1x32xf32>
    %4 = vector.broadcast %3 : vector<1x32xf32> to vector<64x32xf32>
    %5 = arith.addf %2, %4 : vector<64x32xf32>
    %cst_5 = arith.constant 0.000000e+00 : f32
    %6 = vector.broadcast %cst_5 : f32 to vector<64x32xf32>
    %7 = arith.subf %6, %5 : vector<64x32xf32>
    %8 = math.exp %7 : vector<64x32xf32>
    %cst_6 = arith.constant 1.000000e+00 : f32
    %9 = vector.broadcast %cst_6 : f32 to vector<64x32xf32>
    %10 = arith.addf %9, %8 : vector<64x32xf32>
    %11 = tpu.reciprocal %10 {approx = true} : vector<64x32xf32> -> vector<64x32xf32>
    %12 = arith.mulf %5, %11 : vector<64x32xf32>
    %13 = arith.truncf %12 : vector<64x32xf32> to vector<64x32xbf16>
    %c0_7 = arith.constant 0 : index
    %c0_8 = arith.constant 0 : index
    %14 = vector.load %arg4[%c0_7, %c0_8] : memref<64x32xbf16, #tpu.memory_space<vmem>>, vector<64x32xbf16>
    tpu.vector_store %arg4[%c0_7, %c0_8], %13 {strides = array<i32>} : memref<64x32xbf16, #tpu.memory_space<vmem>>, vector<64x32xbf16>,
    return
  }
  func.func @transform_0(%arg0: i32) -> (i32, i32) {
    %c0_i32 = arith.constant 0 : i32
    %c0_i32_0 = arith.constant 0 : i32
    return %arg0, %c0_i32 : i32, i32
  }
  func.func @transform_1(%arg0: i32) -> (i32, i32) {
    %c0_i32 = arith.constant 0 : i32
    %c0_i32_0 = arith.constant 0 : i32
    %c0_i32_1 = arith.constant 0 : i32
    return %c0_i32, %c0_i32_0 : i32, i32
  }
  func.func @transform_2(%arg0: i32) -> (i32, i32) {
    %c0_i32 = arith.constant 0 : i32
    %c0_i32_0 = arith.constant 0 : i32
    %c0_i32_1 = arith.constant 0 : i32
    return %c0_i32, %c0_i32_0 : i32, i32
  }
  func.func @transform_3(%arg0: i32) -> (i32, i32) {
    %c0_i32 = arith.constant 0 : i32
    %c0_i32_0 = arith.constant 0 : i32
    return %arg0, %c0_i32 : i32, i32
  }
}

module attributes {stable_mosaic.version = 11 : i64} {
  func.func @_matmul_shift_silu_kernel(%arg0: i32, %arg1: memref<16x288xbf16, #tpu.memory_space<vmem>>, %arg2: memref<288x64xbf16, #tpu.memory_space<vmem>>, %arg3: memref<1x64xf32, #tpu.memory_space<vmem>>, %arg4: memref<16x64xbf16, #tpu.memory_space<vmem>>) attributes {dimension_semantics = [#tpu.dimension_semantics<parallel>], iteration_bounds = array<i64: 1>, scalar_prefetch = 0 : i64, scratch_operands = 0 : i64, tpu.core_type = #tpu.core_type<tc>, window_params = [{transform_indices = @transform_0, window_bounds = array<i64: 16, 288>}, {pipeline_mode = #tpu.pipeline_mode<synchronous>, transform_indices = @transform_1, window_bounds = array<i64: 288, 64>}, {pipeline_mode = #tpu.pipeline_mode<synchronous>, transform_indices = @transform_2, window_bounds = array<i64: 1, 64>}, {transform_indices = @transform_3, window_bounds = array<i64: 16, 64>}]} {
    %c0 = arith.constant 0 : index
    %c0_0 = arith.constant 0 : index
    %0 = vector.load %arg1[%c0, %c0_0] : memref<16x288xbf16, #tpu.memory_space<vmem>>, vector<16x288xbf16>
    %c0_1 = arith.constant 0 : index
    %c0_2 = arith.constant 0 : index
    %1 = vector.load %arg2[%c0_1, %c0_2] : memref<288x64xbf16, #tpu.memory_space<vmem>>, vector<288x64xbf16>
    %cst = arith.constant dense<0.000000e+00> : vector<16x64xf32>
    %2 = tpu.matmul %0, %1, %cst {dimension_numbers = #tpu.dot_dimension_numbers<[1], [0], [0], [1], [0, 0, 1, 1], [], []>} : vector<16x288xbf16>, vector<288x64xbf16>, vector<16x64xf32> -> vector<16x64xf32>
    %c0_3 = arith.constant 0 : index
    %c0_4 = arith.constant 0 : index
    %3 = vector.load %arg3[%c0_3, %c0_4] : memref<1x64xf32, #tpu.memory_space<vmem>>, vector<1x64xf32>
    %4 = vector.broadcast %3 : vector<1x64xf32> to vector<16x64xf32>
    %5 = arith.addf %2, %4 : vector<16x64xf32>
    %cst_5 = arith.constant 0.000000e+00 : f32
    %6 = vector.broadcast %cst_5 : f32 to vector<16x64xf32>
    %7 = arith.subf %6, %5 : vector<16x64xf32>
    %8 = math.exp %7 : vector<16x64xf32>
    %cst_6 = arith.constant 1.000000e+00 : f32
    %9 = vector.broadcast %cst_6 : f32 to vector<16x64xf32>
    %10 = arith.addf %9, %8 : vector<16x64xf32>
    %11 = tpu.reciprocal %10 {approx = true} : vector<16x64xf32> -> vector<16x64xf32>
    %12 = arith.mulf %5, %11 : vector<16x64xf32>
    %13 = arith.truncf %12 : vector<16x64xf32> to vector<16x64xbf16>
    %c0_7 = arith.constant 0 : index
    %c0_8 = arith.constant 0 : index
    %14 = vector.load %arg4[%c0_7, %c0_8] : memref<16x64xbf16, #tpu.memory_space<vmem>>, vector<16x64xbf16>
    tpu.vector_store %arg4[%c0_7, %c0_8], %13 {strides = array<i32>} : memref<16x64xbf16, #tpu.memory_space<vmem>>, vector<16x64xbf16>,
    return
  }
  func.func @transform_0(%arg0: i32) -> (i32, i32) {
    %c0_i32 = arith.constant 0 : i32
    %c0_i32_0 = arith.constant 0 : i32
    return %arg0, %c0_i32 : i32, i32
  }
  func.func @transform_1(%arg0: i32) -> (i32, i32) {
    %c0_i32 = arith.constant 0 : i32
    %c0_i32_0 = arith.constant 0 : i32
    %c0_i32_1 = arith.constant 0 : i32
    return %c0_i32, %c0_i32_0 : i32, i32
  }
  func.func @transform_2(%arg0: i32) -> (i32, i32) {
    %c0_i32 = arith.constant 0 : i32
    %c0_i32_0 = arith.constant 0 : i32
    %c0_i32_1 = arith.constant 0 : i32
    return %c0_i32, %c0_i32_0 : i32, i32
  }
  func.func @transform_3(%arg0: i32) -> (i32, i32) {
    %c0_i32 = arith.constant 0 : i32
    %c0_i32_0 = arith.constant 0 : i32
    return %arg0, %c0_i32 : i32, i32
  }
}

module attributes {stable_mosaic.version = 11 : i64} {
  func.func @_matmul_shift_silu_kernel(%arg0: i32, %arg1: memref<16x576xbf16, #tpu.memory_space<vmem>>, %arg2: memref<576x128xbf16, #tpu.memory_space<vmem>>, %arg3: memref<1x128xf32, #tpu.memory_space<vmem>>, %arg4: memref<16x128xbf16, #tpu.memory_space<vmem>>) attributes {dimension_semantics = [#tpu.dimension_semantics<parallel>], iteration_bounds = array<i64: 1>, scalar_prefetch = 0 : i64, scratch_operands = 0 : i64, tpu.core_type = #tpu.core_type<tc>, window_params = [{transform_indices = @transform_0, window_bounds = array<i64: 16, 576>}, {pipeline_mode = #tpu.pipeline_mode<synchronous>, transform_indices = @transform_1, window_bounds = array<i64: 576, 128>}, {pipeline_mode = #tpu.pipeline_mode<synchronous>, transform_indices = @transform_2, window_bounds = array<i64: 1, 128>}, {transform_indices = @transform_3, window_bounds = array<i64: 16, 128>}]} {
    %c0 = arith.constant 0 : index
    %c0_0 = arith.constant 0 : index
    %0 = vector.load %arg1[%c0, %c0_0] : memref<16x576xbf16, #tpu.memory_space<vmem>>, vector<16x576xbf16>
    %c0_1 = arith.constant 0 : index
    %c0_2 = arith.constant 0 : index
    %1 = vector.load %arg2[%c0_1, %c0_2] : memref<576x128xbf16, #tpu.memory_space<vmem>>, vector<576x128xbf16>
    %cst = arith.constant dense<0.000000e+00> : vector<16x128xf32>
    %2 = tpu.matmul %0, %1, %cst {dimension_numbers = #tpu.dot_dimension_numbers<[1], [0], [0], [1], [0, 0, 1, 1], [], []>} : vector<16x576xbf16>, vector<576x128xbf16>, vector<16x128xf32> -> vector<16x128xf32>
    %c0_3 = arith.constant 0 : index
    %c0_4 = arith.constant 0 : index
    %3 = vector.load %arg3[%c0_3, %c0_4] : memref<1x128xf32, #tpu.memory_space<vmem>>, vector<1x128xf32>
    %4 = vector.broadcast %3 : vector<1x128xf32> to vector<16x128xf32>
    %5 = arith.addf %2, %4 : vector<16x128xf32>
    %cst_5 = arith.constant 0.000000e+00 : f32
    %6 = vector.broadcast %cst_5 : f32 to vector<16x128xf32>
    %7 = arith.subf %6, %5 : vector<16x128xf32>
    %8 = math.exp %7 : vector<16x128xf32>
    %cst_6 = arith.constant 1.000000e+00 : f32
    %9 = vector.broadcast %cst_6 : f32 to vector<16x128xf32>
    %10 = arith.addf %9, %8 : vector<16x128xf32>
    %11 = tpu.reciprocal %10 {approx = true} : vector<16x128xf32> -> vector<16x128xf32>
    %12 = arith.mulf %5, %11 : vector<16x128xf32>
    %13 = arith.truncf %12 : vector<16x128xf32> to vector<16x128xbf16>
    %c0_7 = arith.constant 0 : index
    %c0_8 = arith.constant 0 : index
    %14 = vector.load %arg4[%c0_7, %c0_8] : memref<16x128xbf16, #tpu.memory_space<vmem>>, vector<16x128xbf16>
    tpu.vector_store %arg4[%c0_7, %c0_8], %13 {strides = array<i32>} : memref<16x128xbf16, #tpu.memory_space<vmem>>, vector<16x128xbf16>,
    return
  }
  func.func @transform_0(%arg0: i32) -> (i32, i32) {
    %c0_i32 = arith.constant 0 : i32
    %c0_i32_0 = arith.constant 0 : i32
    return %arg0, %c0_i32 : i32, i32
  }
  func.func @transform_1(%arg0: i32) -> (i32, i32) {
    %c0_i32 = arith.constant 0 : i32
    %c0_i32_0 = arith.constant 0 : i32
    %c0_i32_1 = arith.constant 0 : i32
    return %c0_i32, %c0_i32_0 : i32, i32
  }
  func.func @transform_2(%arg0: i32) -> (i32, i32) {
    %c0_i32 = arith.constant 0 : i32
    %c0_i32_0 = arith.constant 0 : i32
    %c0_i32_1 = arith.constant 0 : i32
    return %c0_i32, %c0_i32_0 : i32, i32
  }
  func.func @transform_3(%arg0: i32) -> (i32, i32) {
    %c0_i32 = arith.constant 0 : i32
    %c0_i32_0 = arith.constant 0 : i32
    return %arg0, %c0_i32 : i32, i32
  }
}

module attributes {stable_mosaic.version = 11 : i64} {
  func.func @_matmul_shift_silu_kernel(%arg0: i32, %arg1: memref<16x1152xbf16, #tpu.memory_space<vmem>>, %arg2: memref<1152x32xbf16, #tpu.memory_space<vmem>>, %arg3: memref<1x32xf32, #tpu.memory_space<vmem>>, %arg4: memref<16x32xf32, #tpu.memory_space<vmem>>) attributes {dimension_semantics = [#tpu.dimension_semantics<parallel>], iteration_bounds = array<i64: 1>, scalar_prefetch = 0 : i64, scratch_operands = 0 : i64, tpu.core_type = #tpu.core_type<tc>, window_params = [{transform_indices = @transform_0, window_bounds = array<i64: 16, 1152>}, {pipeline_mode = #tpu.pipeline_mode<synchronous>, transform_indices = @transform_1, window_bounds = array<i64: 1152, 32>}, {pipeline_mode = #tpu.pipeline_mode<synchronous>, transform_indices = @transform_2, window_bounds = array<i64: 1, 32>}, {transform_indices = @transform_3, window_bounds = array<i64: 16, 32>}]} {
    %c0 = arith.constant 0 : index
    %c0_0 = arith.constant 0 : index
    %0 = vector.load %arg1[%c0, %c0_0] : memref<16x1152xbf16, #tpu.memory_space<vmem>>, vector<16x1152xbf16>
    %c0_1 = arith.constant 0 : index
    %c0_2 = arith.constant 0 : index
    %1 = vector.load %arg2[%c0_1, %c0_2] : memref<1152x32xbf16, #tpu.memory_space<vmem>>, vector<1152x32xbf16>
    %cst = arith.constant dense<0.000000e+00> : vector<16x32xf32>
    %2 = tpu.matmul %0, %1, %cst {dimension_numbers = #tpu.dot_dimension_numbers<[1], [0], [0], [1], [0, 0, 1, 1], [], []>} : vector<16x1152xbf16>, vector<1152x32xbf16>, vector<16x32xf32> -> vector<16x32xf32>
    %c0_3 = arith.constant 0 : index
    %c0_4 = arith.constant 0 : index
    %3 = vector.load %arg3[%c0_3, %c0_4] : memref<1x32xf32, #tpu.memory_space<vmem>>, vector<1x32xf32>
    %4 = vector.broadcast %3 : vector<1x32xf32> to vector<16x32xf32>
    %5 = arith.addf %2, %4 : vector<16x32xf32>
    %cst_5 = arith.constant 0.000000e+00 : f32
    %6 = vector.broadcast %cst_5 : f32 to vector<16x32xf32>
    %7 = arith.subf %6, %5 : vector<16x32xf32>
    %8 = math.exp %7 : vector<16x32xf32>
    %cst_6 = arith.constant 1.000000e+00 : f32
    %9 = vector.broadcast %cst_6 : f32 to vector<16x32xf32>
    %10 = arith.addf %9, %8 : vector<16x32xf32>
    %cst_7 = arith.constant 1.000000e+00 : f32
    %11 = vector.broadcast %cst_7 : f32 to vector<16x32xf32>
    %12 = arith.divf %11, %10 : vector<16x32xf32>
    %13 = arith.mulf %5, %12 : vector<16x32xf32>
    %c0_8 = arith.constant 0 : index
    %c0_9 = arith.constant 0 : index
    %14 = vector.load %arg4[%c0_8, %c0_9] : memref<16x32xf32, #tpu.memory_space<vmem>>, vector<16x32xf32>
    tpu.vector_store %arg4[%c0_8, %c0_9], %13 {strides = array<i32>} : memref<16x32xf32, #tpu.memory_space<vmem>>, vector<16x32xf32>,
    return
  }
  func.func @transform_0(%arg0: i32) -> (i32, i32) {
    %c0_i32 = arith.constant 0 : i32
    %c0_i32_0 = arith.constant 0 : i32
    return %arg0, %c0_i32 : i32, i32
  }
  func.func @transform_1(%arg0: i32) -> (i32, i32) {
    %c0_i32 = arith.constant 0 : i32
    %c0_i32_0 = arith.constant 0 : i32
    %c0_i32_1 = arith.constant 0 : i32
    return %c0_i32, %c0_i32_0 : i32, i32
  }
  func.func @transform_2(%arg0: i32) -> (i32, i32) {
    %c0_i32 = arith.constant 0 : i32
    %c0_i32_0 = arith.constant 0 : i32
    %c0_i32_1 = arith.constant 0 : i32
    return %c0_i32, %c0_i32_0 : i32, i32
  }
  func.func @transform_3(%arg0: i32) -> (i32, i32) {
    %c0_i32 = arith.constant 0 : i32
    %c0_i32_0 = arith.constant 0 : i32
    return %arg0, %c0_i32 : i32, i32
  }
}

</mosaic_0001>

<bundles_post_ra>
// kernel: tile.8
= control target key start
LH: loop header
LB: loop body
LE: loop exit
PB: predicated region body
PF: predicated region fallthrough
CT: control target
= control target key end

     0   :  { %s28_s0 = inlined_call_operand.vmem [shape: f32[16], index: 0, kind: input, shape index: {}]   ;;  %s29_s1 = inlined_call_operand.vmem [shape: f32[16,16], index: 1, kind: output, shape index: {}]  }
   0x1   :  { %v4_v0 = vld [vmem:[%s28_s0] ss:$0 sm:$0xff] }
   0x2   :  { %5 = vst [vmem:[%s29_s1] sm:$0xff] %v4_v0  ;;  %8 = vst [vmem:[%s29_s1 + $0x8] sm:$0xff] %v4_v0 }

// kernel: tile.9
= control target key start
LH: loop header
LB: loop body
LE: loop exit
PB: predicated region body
PF: predicated region fallthrough
CT: control target
= control target key end

     0   :  { %s7_s6 = smov 3  ;;  %s21_s9 = smov 3  ;;  %vm4_vm0 = vcmask 130048   ;;  %vm11_vm1 = vcmask 1048448   ;;  %vm18_vm2 = vcmask 917248   ;;  %vm25_vm3 = vcmask 786048   ;;  %s131_s0 = inlined_call_operand.vmem [shape: f32[16,16], index: 0, kind: input, shape index: {}]   ;;  %s132_s1 = inlined_call_operand.vmem [shape: f32[1,256], index: 1, kind: output, shape index: {}]  }
   0x1   :  { %v69_v0 = vld [vmem:[%s131_s0 + $0x7] ss:$8 sm:%s7_s6]   ;;  %s84_s10 = smov 112   ;;  %v71_v1 = vld [vmem:[%s131_s0 + $0x5] ss:$8 sm:%s21_s9]   ;;  %s14_s13 = smov 3 }
   0x2   :  { %9 = vrot.lane.b32.xlu0 %v69_v0, %s84_s10  ;;  %s85_s14 = smov 80   ;;  %v70_v2 = vld [vmem:[%s131_s0 + $0x6] ss:$8 sm:%s14_s13]   ;;  %s28_s17 = smov 3  ;;  %vm32_vm4 = vcmask 654848   ;;  %vm39_vm5 = vcmask 523648  }
   0x3   :  { %23 = vrot.lane.b32.xlu1 %v71_v1, %s85_s14  ;;  %v72_v3 = vld [vmem:[%s131_s0 + $0x4] ss:$8 sm:%s28_s17]   ;;  %s35_s20 = smov 3  ;;  %s42_s21 = smov 3  ;;  %vm46_vm6 = vcmask 392448   ;;  %vm53_vm7 = vcmask 261248  }
   0x4   :  { %s86_s22 = smov 96   ;;  %s87_s23 = smov 64   ;;  %v73_v4 = vld [vmem:[%s131_s0 + $0x3] ss:$8 sm:%s35_s20]   ;;  %v74_v5 = vld [vmem:[%s131_s0 + $0x2] ss:$8 sm:%s42_s21]  }
   0x5   :  { %s2_s26 = smov 3  ;;  %s49_s29 = smov 3 }
   0x6   :  { %16 = vrot.lane.b32.xlu0 %v70_v2, %s86_s22  ;;  %v3_v6 = vld [vmem:[%s131_s0] ss:$8 sm:%s2_s26]   ;;  %s88_s3 = smov 48   ;;  %s89_s4 = smov 32  }
   0x7   :  { %30 = vrot.lane.b32.xlu1 %v72_v3, %s87_s23  ;;  %5 = vst.msk [vmem:[#allocation0] ss:$8 sm:$0x3] %vm4_vm0, %v3_v6   ;;  %v75_v7 = vld [vmem:[%s131_s0 + $0x1] ss:$8 sm:%s49_s29]   ;;  %s90_s0 = smov 16  }
   0xa   :  { %37 = vrot.lane.b32.xlu0 %v73_v4, %s88_s3 }
   0xb   :  { %44 = vrot.lane.b32.xlu1 %v74_v5, %s89_s4 }
   0xe   :  { %51 = vrot.lane.b32.xlu0 %v75_v7, %s90_s0 }
  0x74   :  { %v10_v8 = vpop.permute.xlu0 %9  }
  0x75   :  { %12 = vst.msk [vmem:[#allocation0] ss:$8 sm:$0x3] %vm11_vm1, %v10_v8   ;;  %v24_v9 = vpop.permute.xlu1 %23  }
  0x78   :  { %v17_v10 = vpop.permute.xlu0 %16  }
  0x79   :  { %19 = vst.msk [vmem:[#allocation0] ss:$8 sm:$0x3] %vm18_vm2, %v17_v10   ;;  %v31_v11 = vpop.permute.xlu1 %30  }
  0x7a   :  { %26 = vst.msk [vmem:[#allocation0] ss:$8 sm:$0x3] %vm25_vm3, %v24_v9  }
  0x7b   :  { %33 = vst.msk [vmem:[#allocation0] ss:$8 sm:$0x3] %vm32_vm4, %v31_v11  }
  0x7c   :  { %v38_v12 = vpop.permute.xlu0 %37  }
  0x7d   :  { %40 = vst.msk [vmem:[#allocation0] ss:$8 sm:$0x3] %vm39_vm5, %v38_v12   ;;  %v45_v13 = vpop.permute.xlu1 %44  }
  0x7e   :  { %47 = vst.msk [vmem:[#allocation0] ss:$8 sm:$0x3] %vm46_vm6, %v45_v13  }
  0x80   :  { %v52_v14 = vpop.permute.xlu0 %51  }
  0x81   :  { %54 = vst.msk [vmem:[#allocation0] ss:$8 sm:$0x3] %vm53_vm7, %v52_v14  }
  0x88   :  { %v59_v15 = vld [vmem:[#allocation0] sm:$0x1]  ;;  %v64_v16 = vld [vmem:[#allocation0 + $0x8] sm:$0x1] }
  0x89   :  { %62 = vst [vmem:[%s132_s1] sm:$0x1] %v59_v15  ;;  %76 = vst [vmem:[%s132_s1 + $0x1] sm:$0x1] %v64_v16 }

// kernel: stmap_feature_extractor.5
= control target key start
LH: loop header
LB: loop body
LE: loop exit
PB: predicated region body
PF: predicated region fallthrough
CT: control target
= control target key end

     0   :  { %s1530_s12 = smov 0   ;;  %s1532_s13 = smov 0   ;;  %s2125_s0 = inlined_call_operand.vmem [shape: bf16[8,32,162], index: 0, kind: input, shape index: {}]   ;;  %s2126_s1 = inlined_call_operand.vmem [shape: bf16[162,256], index: 1, kind: input, shape index: {}]   ;;  %s2127_s2 = inlined_call_operand.vmem [shape: f32[1,256], index: 2, kind: input, shape index: {}]   ;;  %s2128_s3 = inlined_call_operand.vmem [shape: bf16[32,256], index: 3, kind: output, shape index: {}]  }
   0x1   :  { %s1534_s14 = smov 0  }
   0x2 LB: > { %s1188_s15 = sadd.s32 4294967295, %s1508_s14   ;;  %s1547_s16 = sadd.s32 1, %s1508_s14   ;;  %s1508_s14 = sphi %s1534_s14, %s2137_s14   ;;  %s1504_s13 = sphi %s1532_s13, %s2136_s13   ;;  %s1500_s12 = sphi %s1530_s12, %s2135_s12  }
   0x3   : > { %s17_s17 = ssub.s32 %s1508_s14, %s1547_s16  ;;  %s20_s18 = sadd.s32 1, %s1504_s13 }
   0x4   : > { %p18_p0 = scmp.eq.s32.totalorder %s17_s17, 0  ;;  %p27_p1 = scmp.ne.s32.totalorder %s1504_s13, %s1500_s12 }
   0x5   : > { %p28_p2 = scmp.eq.s32.totalorder %s1508_s14, 0  ;;  %p1191_p4 = scmp.ge.s32.totalorder %s1508_s14, 2 }
   0x6   : > { %s1556_s19 = scalar_select %p18_p0, %s1504_s13, %s20_s18  }
   0x7   : > { %p29_p3 = por %p28_p2, %p27_p1  ;;  %127 = sbr.rel (%p1191_p4) target bundleno = 24 (0x18), region = 24 }
   0xc   : > { %130 = sbr.rel (!%p29_p3) target bundleno = 24 (0x18), region = 28  ;;  %s132_s20 = sand.u32 (%p29_p3), 1, %s1504_s13  }
   0xd   : > { %s1274_s21 = sshll.u32 (%p29_p3), %s1508_s14, 4  ;;  %s1192_s22 = sshll.u32 (%p29_p3), %s132_s20, 7 }
   0xe   : > { %s1564_s25 = scalar_lea.vmem (%p29_p3), %s2125_s0, %s1274_s21  ;;  %s134_s26 = scalar_lea.vmem (%p29_p3), [#allocation2], %s1192_s22 }
   0xf   : > { %v197_v0 = vld [vmem:[%s1564_s25] sm:$0xff] (%p29_p3)  ;;  %v199_v1 = vld [vmem:[%s1564_s25 + $0x8] sm:$0xff] (%p29_p3) }
  0x10   : > { %v201_v2 = vld [vmem:[%s1564_s25 + $0x20] sm:$0xff] (%p29_p3)  ;;  %198 = vst [vmem:[%s134_s26] sm:$0xff] (%p29_p3), %v197_v0  ;;  %200 = vst [vmem:[%s134_s26 + $0x8] sm:$0xff] (%p29_p3), %v199_v1  ;;  %v203_v3 = vld [vmem:[%s1564_s25 + $0x28] sm:$0xff] (%p29_p3) }
  0x11   : > { %202 = vst [vmem:[%s134_s26 + $0x10] sm:$0xff] %v201_v2  ;;  %v205_v4 = vld [vmem:[%s1564_s25 + $0x40] sm:$0xff]  ;;  %v207_v5 = vld [vmem:[%s1564_s25 + $0x48] sm:$0xff]  ;;  %204 = vst [vmem:[%s134_s26 + $0x18] sm:$0xff] %v203_v3 }
  0x12   : > { %206 = vst [vmem:[%s134_s26 + $0x20] sm:$0xff] %v205_v4  ;;  %208 = vst [vmem:[%s134_s26 + $0x28] sm:$0xff] %v207_v5  ;;  %v209_v6 = vld [vmem:[%s1564_s25 + $0x60] sm:$0xff]  ;;  %v211_v7 = vld [vmem:[%s1564_s25 + $0x68] sm:$0xff] }
  0x13   : > { %v213_v8 = vld [vmem:[%s1564_s25 + $0x80] sm:$0xff]  ;;  %210 = vst [vmem:[%s134_s26 + $0x30] sm:$0xff] %v209_v6  ;;  %212 = vst [vmem:[%s134_s26 + $0x38] sm:$0xff] %v211_v7  ;;  %v215_v9 = vld [vmem:[%s1564_s25 + $0x88] sm:$0xff] }
  0x14   : > { %214 = vst [vmem:[%s134_s26 + $0x40] sm:$0xff] %v213_v8  ;;  %v217_v10 = vld [vmem:[%s1564_s25 + $0xa0] sm:$0xff]  ;;  %v219_v11 = vld [vmem:[%s1564_s25 + $0xa8] sm:$0xff]  ;;  %216 = vst [vmem:[%s134_s26 + $0x48] sm:$0xff] %v215_v9 }
  0x15   : > { %218 = vst [vmem:[%s134_s26 + $0x50] sm:$0xff] %v217_v10  ;;  %220 = vst [vmem:[%s134_s26 + $0x58] sm:$0xff] %v219_v11  ;;  %v221_v12 = vld [vmem:[%s1564_s25 + $0xc0] sm:$0xff]  ;;  %v223_v13 = vld [vmem:[%s1564_s25 + $0xc8] sm:$0xff] }
  0x16   : > { %v225_v14 = vld [vmem:[%s1564_s25 + $0xe0] sm:$0xff]  ;;  %222 = vst [vmem:[%s134_s26 + $0x60] sm:$0xff] %v221_v12  ;;  %224 = vst [vmem:[%s134_s26 + $0x68] sm:$0xff] %v223_v13  ;;  %v227_v15 = vld [vmem:[%s1564_s25 + $0xe8] sm:$0xff] }
  0x17   : > { %226 = vst [vmem:[%s134_s26 + $0x70] sm:$0xff] %v225_v14  ;;  %228 = vst [vmem:[%s134_s26 + $0x78] sm:$0xff] %v227_v15 }
  0x18 PF: > { %p1196_p5 = scmp.ge.s32.totalorder %s1508_s14, 1  ;;  %p233_p6 = scmp.lt.s32.totalorder %s1508_s14, 3 }
  0x1a   : > { %p234_p7 = pnand %p1196_p5, %p233_p6 }
  0x1c   : > { %237 = sbr.rel (%p234_p7) target bundleno = 456 (0x1c8), region = 66 }
  0x21   : > { %v1587_v16 = vld [vmem:[%s2126_s1 + $0x74] ss:$8 sps:$4 sm:$0xff]   ;;  %v1592_v17 = vld [vmem:[%s2126_s1 + $0x70] ss:$8 sps:$4 sm:$0xff]   ;;  %v1599_v18 = vld [vmem:[%s2126_s1 + $0x64] ss:$8 sps:$4 sm:$0xff]   ;;  %v296_v56 = vlaneseq }
  0x22   : > { %433 = vmatprep.subr.bf16.mxu0 %v1587_v16  ;;  %519 = vmatprep.subr.bf16.mxu1 %v1587_v16  ;;  %v1606_v19 = vld [vmem:[%s2126_s1 + $0x60] ss:$8 sps:$4 sm:$0xff]   ;;  %v1613_v20 = vld [vmem:[%s2126_s1 + $0x54] ss:$8 sps:$4 sm:$0xff]   ;;  %s240_s10 = sand.u32 1, %s1500_s12   ;;  %vm422_vm0 = vcmask 277504  }
  0x23   : > { %434 = vmatpush1.bf16.msra.mxu0 %v1592_v17  ;;  %520 = vmatpush1.bf16.msra.mxu1 %v1592_v17  ;;  %v1621_v21 = vld [vmem:[%s2126_s1 + $0x50] ss:$8 sps:$4 sm:$0xff]   ;;  %v1628_v22 = vld [vmem:[%s2126_s1 + $0x44] ss:$8 sps:$4 sm:$0xff]   ;;  %s1197_s21 = sshll.u32 %s240_s10, 7  ;;  %vm426_vm1 = vcmask 1040384  }
  0x24   : > { %435 = vmatprep.subr.bf16.mxu0 %v1599_v18  ;;  %521 = vmatprep.subr.bf16.mxu1 %v1599_v18  ;;  %v1635_v23 = vld [vmem:[%s2126_s1 + $0x40] ss:$8 sps:$4 sm:$0xff]   ;;  %v1642_v24 = vld [vmem:[%s2126_s1 + $0x34] ss:$8 sps:$4 sm:$0xff]   ;;  %s1644_s25 = scalar_lea.vmem [#allocation2], %s1197_s21  ;;  %v297_v57 = vshrl.u32 %v296_v56, 7 }
  0x25   : > { %v1649_v25 = vld [vmem:[%s2126_s1 + $0x30] ss:$8 sps:$4 sm:$0xff]   ;;  %v1336_v26 = vld [vmem:[%s1644_s25 + $0x4] ss:$8 sps:$4 sm:$0xff]   ;;  %v1339_v28 = vld [vmem:[%s1644_s25 + $0x14] ss:$8 sps:$4 sm:$0xff]  }
  0x26   : > { %v1657_v27 = vld [vmem:[%s2126_s1 + $0x24] ss:$8 sps:$4 sm:$0xff]   ;;  %1226 = vmatprep.mubr.msk.bf16.mxu0 %vm422_vm0, %v1336_v26  ;;  %1232 = vmatprep.mubr.msk.bf16.mxu1 %vm422_vm0, %v1339_v28  ;;  %v1669_v29 = vld [vmem:[%s2126_s1 + $0x20] ss:$8 sps:$4 sm:$0xff]   ;;  %v1676_v30 = vld [vmem:[%s2126_s1 + $0x14] ss:$8 sps:$4 sm:$0xff]  }
  0x27   : > { %436 = vmatpush1.bf16.msra.mxu0 %v1606_v19  ;;  %522 = vmatpush1.bf16.msra.mxu1 %v1606_v19  ;;  %v1683_v31 = vld [vmem:[%s2126_s1 + $0x10] ss:$8 sps:$4 sm:$0xff]   ;;  %v1690_v32 = vld [vmem:[%s2126_s1 + $0x4] ss:$8 sps:$4 sm:$0xff]   ;;  %v1700_v34 = vld [vmem:[%s2126_s1] ss:$8 sps:$4 sm:$0xff]  }
  0x28   : > { %437 = vmatprep.subr.bf16.mxu0 %v1613_v20  ;;  %523 = vmatprep.subr.bf16.mxu1 %v1613_v20  ;;  %v293_v33 = vld [vmem:[%s2126_s1 + $0xa0] sm:$0x11]  ;;  %v1718_v38 = vld [vmem:[%s2126_s1 + $0x94] ss:$8 sps:$4 sm:$0xff]   ;;  %v1725_v39 = vld [vmem:[%s2126_s1 + $0x90] ss:$8 sps:$4 sm:$0xff]  }
  0x29   : > { %v1704_v35 = vcombine.high %v293_v33, %v293_v33  ;;  %v1223_v36 = vcombine.low %v293_v33, %v293_v33  ;;  %v1732_v40 = vld [vmem:[%s2126_s1 + $0x84] ss:$8 sps:$4 sm:$0xff]   ;;  %v1739_v41 = vld [vmem:[%s2126_s1 + $0x80] ss:$8 sps:$4 sm:$0xff]   ;;  %v1337_v43 = vld [vmem:[%s1644_s25 + $0x10] ss:$8 sps:$4 sm:$0xff]  }
  0x2a   : > { %v1334_v42 = vld [vmem:[%s1644_s25] ss:$8 sps:$4 sm:$0xff]   ;;  %v1340_v44 = vld [vmem:[%s1644_s25 + $0x24] ss:$8 sps:$4 sm:$0xff]   ;;  %v1342_v45 = vld [vmem:[%s1644_s25 + $0x34] ss:$8 sps:$4 sm:$0xff]  }
  0x2b   : > { %438 = vmatpush1.bf16.msra.mxu0 %v1621_v21  ;;  %524 = vmatpush1.bf16.msra.mxu1 %v1621_v21  ;;  %v1713_v37 = vsel %vm426_vm1, %v1223_v36, 0  ;;  %v1344_v46 = vld [vmem:[%s1644_s25 + $0x20] ss:$8 sps:$4 sm:$0xff]   ;;  %v1345_v47 = vld [vmem:[%s1644_s25 + $0x30] ss:$8 sps:$4 sm:$0xff]   ;;  %v298_v58 = vsub.s32 0, %v297_v57 }
  0x2c   : > { %439 = vmatprep.subr.bf16.mxu0 %v1628_v22  ;;  %525 = vmatprep.subr.bf16.mxu1 %v1628_v22  ;;  %v1346_v48 = vld [vmem:[%s1644_s25 + $0x44] ss:$8 sps:$4 sm:$0xff]   ;;  %v1348_v49 = vld [vmem:[%s1644_s25 + $0x54] ss:$8 sps:$4 sm:$0xff]   ;;  %v1350_v50 = vld [vmem:[%s1644_s25 + $0x40] ss:$8 sps:$4 sm:$0xff]  }
  0x2d   : > { %v1351_v51 = vld [vmem:[%s1644_s25 + $0x50] ss:$8 sps:$4 sm:$0xff]   ;;  %v1352_v52 = vld [vmem:[%s1644_s25 + $0x64] ss:$8 sps:$4 sm:$0xff]   ;;  %v1354_v53 = vld [vmem:[%s1644_s25 + $0x74] ss:$8 sps:$4 sm:$0xff]  }
  0x2e   : > { %v1356_v54 = vld [vmem:[%s1644_s25 + $0x60] ss:$8 sps:$4 sm:$0xff]   ;;  %v1357_v55 = vld [vmem:[%s1644_s25 + $0x70] ss:$8 sps:$4 sm:$0xff]   ;;  %v302_v62 = vsub.s32 1, %v297_v57  ;;  %s1198_s25 = sshll.u32 %s1188_s15, 1 }
  0x2f   : > { %440 = vmatpush1.bf16.msra.mxu0 %v1635_v23  ;;  %526 = vmatpush1.bf16.msra.mxu1 %v1635_v23  ;;  %v294_v59 = vld [vmem:[%s2127_s2] sm:$0x3]  ;;  %p266_p8 = scmp.lt.s32.totalorder %s1198_s25, 3 }
  0x30   : > { %441 = vmatprep.subr.bf16.mxu0 %v1642_v24  ;;  %527 = vmatprep.subr.bf16.mxu1 %v1642_v24  ;;  %v1906_v63 = vrot.slane %v294_v59, %v298_v58  ;;  %v1908_v1 = vrot.slane %v294_v59, %v302_v62 }
  0x31   : > { %s2139_s25 = smov (!%p266_p8, %s1198_s25), 3 }
  0x32   : > { %s1275_s14 = sshll.u32 %s2139_s25, 3 }
  0x33   : > { %442 = vmatpush1.bf16.msra.mxu0 %v1649_v25  ;;  %528 = vmatpush1.bf16.msra.mxu1 %v1649_v25  ;;  %s270_s5 = scalar_lea.vmem %s2128_s3, %s1275_s14 }
  0x34   : > { %443 = vmatprep.subr.bf16.mxu0 %v1657_v27  ;;  %529 = vmatprep.subr.bf16.mxu1 %v1657_v27 }
  0x37   : > { %444 = vmatpush1.bf16.msra.mxu0 %v1669_v29  ;;  %530 = vmatpush1.bf16.msra.mxu1 %v1669_v29 }
  0x38   : > { %445 = vmatprep.subr.bf16.mxu0 %v1676_v30  ;;  %531 = vmatprep.subr.bf16.mxu1 %v1676_v30 }
  0x3b   : > { %446 = vmatpush1.bf16.msra.mxu0 %v1683_v31  ;;  %532 = vmatpush1.bf16.msra.mxu1 %v1683_v31 }
  0x3c   : > { %447 = vmatprep.subr.bf16.mxu0 %v1690_v32  ;;  %533 = vmatprep.subr.bf16.mxu1 %v1690_v32 }
  0x3f   : > { %448 = vmatpush1.bf16.msra.mxu0 %v1700_v34  ;;  %534 = vmatpush1.bf16.msra.mxu1 %v1700_v34 }
  0x40   : > { %1225 = vmatprep.subr.msk.bf16.mxu0 %vm426_vm1, %v1704_v35  ;;  %1231 = vmatprep.subr.msk.bf16.mxu1 %vm426_vm1, %v1704_v35 }
  0x43   : > { %460 = vmatpush2.bf16.msra.mxu0 %v1713_v37  ;;  %546 = vmatpush2.bf16.msra.mxu1 %v1713_v37 }
  0x44   : > { %461 = vmatprep.subr.bf16.mxu0 %v1718_v38  ;;  %547 = vmatprep.subr.bf16.mxu1 %v1718_v38 }
  0x47   : > { %462 = vmatpush2.bf16.msra.mxu0 %v1725_v39  ;;  %548 = vmatpush2.bf16.msra.mxu1 %v1725_v39 }
  0x48   : > { %463 = vmatprep.subr.bf16.mxu0 %v1732_v40  ;;  %549 = vmatprep.subr.bf16.mxu1 %v1732_v40 }
  0x4b   : > { %464 = vmatpush2.bf16.msra.mxu0 %v1739_v41  ;;  %550 = vmatpush2.bf16.msra.mxu1 %v1739_v41 }
  0x4c   : > { %605 = vmatprep.subr.bf16.mxu0 %v1587_v16  ;;  %691 = vmatprep.subr.bf16.mxu1 %v1587_v16 }
  0x4e   : > { %466 = vmatmul.mubr.bf16.vlgmr.msra.gmra.mxu0 %v1334_v42  ;;  %552 = vmatmul.mubr.bf16.vlgmr.msra.gmra.mxu1 %v1337_v43 }
  0x4f   : > { %606 = vmatpush1.bf16.msra.mxu0 %v1592_v17  ;;  %692 = vmatpush1.bf16.msra.mxu1 %v1592_v17 }
  0x50   : > { %607 = vmatprep.subr.bf16.mxu0 %v1599_v18  ;;  %693 = vmatprep.subr.bf16.mxu1 %v1599_v18 }
  0x51   : > { %1238 = vmatprep.mubr.msk.bf16.mxu0 %vm422_vm0, %v1340_v44  ;;  %1244 = vmatprep.mubr.msk.bf16.mxu1 %vm422_vm0, %v1342_v45 }
  0x53   : > { %608 = vmatpush1.bf16.msra.mxu0 %v1606_v19  ;;  %694 = vmatpush1.bf16.msra.mxu1 %v1606_v19 }
  0x54   : > { %609 = vmatprep.subr.bf16.mxu0 %v1613_v20  ;;  %695 = vmatprep.subr.bf16.mxu1 %v1613_v20 }
  0x57   : > { %610 = vmatpush1.bf16.msra.mxu0 %v1621_v21  ;;  %696 = vmatpush1.bf16.msra.mxu1 %v1621_v21 }
  0x58   : > { %611 = vmatprep.subr.bf16.mxu0 %v1628_v22  ;;  %697 = vmatprep.subr.bf16.mxu1 %v1628_v22 }
  0x5b   : > { %612 = vmatpush1.bf16.msra.mxu0 %v1635_v23  ;;  %698 = vmatpush1.bf16.msra.mxu1 %v1635_v23 }
  0x5c   : > { %613 = vmatprep.subr.bf16.mxu0 %v1642_v24  ;;  %699 = vmatprep.subr.bf16.mxu1 %v1642_v24 }
  0x5f   : > { %614 = vmatpush1.bf16.msra.mxu0 %v1649_v25  ;;  %700 = vmatpush1.bf16.msra.mxu1 %v1649_v25 }
  0x60   : > { %615 = vmatprep.subr.bf16.mxu0 %v1657_v27  ;;  %701 = vmatprep.subr.bf16.mxu1 %v1657_v27 }
  0x63   : > { %616 = vmatpush1.bf16.msra.mxu0 %v1669_v29  ;;  %702 = vmatpush1.bf16.msra.mxu1 %v1669_v29 }
  0x64   : > { %617 = vmatprep.subr.bf16.mxu0 %v1676_v30  ;;  %703 = vmatprep.subr.bf16.mxu1 %v1676_v30 }
  0x67   : > { %618 = vmatpush1.bf16.msra.mxu0 %v1683_v31  ;;  %704 = vmatpush1.bf16.msra.mxu1 %v1683_v31 }
  0x68   : > { %619 = vmatprep.subr.bf16.mxu0 %v1690_v32  ;;  %705 = vmatprep.subr.bf16.mxu1 %v1690_v32 }
  0x6b   : > { %620 = vmatpush1.bf16.msra.mxu0 %v1700_v34  ;;  %706 = vmatpush1.bf16.msra.mxu1 %v1700_v34 }
  0x6c   : > { %1237 = vmatprep.subr.msk.bf16.mxu0 %vm426_vm1, %v1704_v35  ;;  %1243 = vmatprep.subr.msk.bf16.mxu1 %vm426_vm1, %v1704_v35 }
  0x6f   : > { %632 = vmatpush2.bf16.msra.mxu0 %v1713_v37  ;;  %718 = vmatpush2.bf16.msra.mxu1 %v1713_v37 }
  0x70   : > { %633 = vmatprep.subr.bf16.mxu0 %v1718_v38  ;;  %719 = vmatprep.subr.bf16.mxu1 %v1718_v38 }
  0x73   : > { %634 = vmatpush2.bf16.msra.mxu0 %v1725_v39  ;;  %720 = vmatpush2.bf16.msra.mxu1 %v1725_v39 }
  0x74   : > { %635 = vmatprep.subr.bf16.mxu0 %v1732_v40  ;;  %721 = vmatprep.subr.bf16.mxu1 %v1732_v40 }
  0x77   : > { %636 = vmatpush2.bf16.msra.mxu0 %v1739_v41  ;;  %722 = vmatpush2.bf16.msra.mxu1 %v1739_v41 }
  0x78   : > { %777 = vmatprep.subr.bf16.mxu0 %v1587_v16  ;;  %863 = vmatprep.subr.bf16.mxu1 %v1587_v16 }
  0x7a   : > { %638 = vmatmul.mubr.bf16.vlgmr.msra.gmra.mxu0 %v1344_v46  ;;  %724 = vmatmul.mubr.bf16.vlgmr.msra.gmra.mxu1 %v1345_v47 }
  0x7b   : > { %778 = vmatpush1.bf16.msra.mxu0 %v1592_v17  ;;  %864 = vmatpush1.bf16.msra.mxu1 %v1592_v17 }
  0x7c   : > { %779 = vmatprep.subr.bf16.mxu0 %v1599_v18  ;;  %865 = vmatprep.subr.bf16.mxu1 %v1599_v18 }
  0x7d   : > { %1250 = vmatprep.mubr.msk.bf16.mxu0 %vm422_vm0, %v1346_v48  ;;  %1256 = vmatprep.mubr.msk.bf16.mxu1 %vm422_vm0, %v1348_v49 }
  0x7f   : > { %780 = vmatpush1.bf16.msra.mxu0 %v1606_v19  ;;  %866 = vmatpush1.bf16.msra.mxu1 %v1606_v19 }
  0x80   : > { %781 = vmatprep.subr.bf16.mxu0 %v1613_v20  ;;  %867 = vmatprep.subr.bf16.mxu1 %v1613_v20 }
  0x83   : > { %782 = vmatpush1.bf16.msra.mxu0 %v1621_v21  ;;  %868 = vmatpush1.bf16.msra.mxu1 %v1621_v21 }
  0x84   : > { %783 = vmatprep.subr.bf16.mxu0 %v1628_v22  ;;  %869 = vmatprep.subr.bf16.mxu1 %v1628_v22 }
  0x87   : > { %784 = vmatpush1.bf16.msra.mxu0 %v1635_v23  ;;  %870 = vmatpush1.bf16.msra.mxu1 %v1635_v23 }
  0x88   : > { %785 = vmatprep.subr.bf16.mxu0 %v1642_v24  ;;  %871 = vmatprep.subr.bf16.mxu1 %v1642_v24 }
  0x8b   : > { %786 = vmatpush1.bf16.msra.mxu0 %v1649_v25  ;;  %872 = vmatpush1.bf16.msra.mxu1 %v1649_v25 }
  0x8c   : > { %787 = vmatprep.subr.bf16.mxu0 %v1657_v27  ;;  %873 = vmatprep.subr.bf16.mxu1 %v1657_v27 }
  0x8f   : > { %788 = vmatpush1.bf16.msra.mxu0 %v1669_v29  ;;  %874 = vmatpush1.bf16.msra.mxu1 %v1669_v29 }
  0x90   : > { %789 = vmatprep.subr.bf16.mxu0 %v1676_v30  ;;  %875 = vmatprep.subr.bf16.mxu1 %v1676_v30 }
  0x93   : > { %790 = vmatpush1.bf16.msra.mxu0 %v1683_v31  ;;  %876 = vmatpush1.bf16.msra.mxu1 %v1683_v31 }
  0x94   : > { %791 = vmatprep.subr.bf16.mxu0 %v1690_v32  ;;  %877 = vmatprep.subr.bf16.mxu1 %v1690_v32 }
  0x97   : > { %792 = vmatpush1.bf16.msra.mxu0 %v1700_v34  ;;  %878 = vmatpush1.bf16.msra.mxu1 %v1700_v34 }
  0x98   : > { %1249 = vmatprep.subr.msk.bf16.mxu0 %vm426_vm1, %v1704_v35  ;;  %1255 = vmatprep.subr.msk.bf16.mxu1 %vm426_vm1, %v1704_v35 }
  0x9b   : > { %804 = vmatpush2.bf16.msra.mxu0 %v1713_v37  ;;  %890 = vmatpush2.bf16.msra.mxu1 %v1713_v37 }
  0x9c   : > { %805 = vmatprep.subr.bf16.mxu0 %v1718_v38  ;;  %891 = vmatprep.subr.bf16.mxu1 %v1718_v38 }
  0x9f   : > { %806 = vmatpush2.bf16.msra.mxu0 %v1725_v39  ;;  %892 = vmatpush2.bf16.msra.mxu1 %v1725_v39 }
  0xa0   : > { %807 = vmatprep.subr.bf16.mxu0 %v1732_v40  ;;  %893 = vmatprep.subr.bf16.mxu1 %v1732_v40 }
  0xa3   : > { %808 = vmatpush2.bf16.msra.mxu0 %v1739_v41  ;;  %894 = vmatpush2.bf16.msra.mxu1 %v1739_v41 }
  0xa4   : > { %949 = vmatprep.subr.bf16.mxu0 %v1587_v16  ;;  %1035 = vmatprep.subr.bf16.mxu1 %v1587_v16 }
  0xa6   : > { %810 = vmatmul.mubr.bf16.vlgmr.msra.gmra.mxu0 %v1350_v50  ;;  %896 = vmatmul.mubr.bf16.vlgmr.msra.gmra.mxu1 %v1351_v51 }
  0xa7   : > { %950 = vmatpush1.bf16.msra.mxu0 %v1592_v17  ;;  %1036 = vmatpush1.bf16.msra.mxu1 %v1592_v17 }
  0xa8   : > { %951 = vmatprep.subr.bf16.mxu0 %v1599_v18  ;;  %1037 = vmatprep.subr.bf16.mxu1 %v1599_v18 }
  0xa9   : > { %1262 = vmatprep.mubr.msk.bf16.mxu0 %vm422_vm0, %v1352_v52  ;;  %1268 = vmatprep.mubr.msk.bf16.mxu1 %vm422_vm0, %v1354_v53 }
  0xab   : > { %952 = vmatpush1.bf16.msra.mxu0 %v1606_v19  ;;  %1038 = vmatpush1.bf16.msra.mxu1 %v1606_v19 }
  0xac   : > { %953 = vmatprep.subr.bf16.mxu0 %v1613_v20  ;;  %1039 = vmatprep.subr.bf16.mxu1 %v1613_v20 }
  0xaf   : > { %954 = vmatpush1.bf16.msra.mxu0 %v1621_v21  ;;  %1040 = vmatpush1.bf16.msra.mxu1 %v1621_v21 }
  0xb0   : > { %955 = vmatprep.subr.bf16.mxu0 %v1628_v22  ;;  %1041 = vmatprep.subr.bf16.mxu1 %v1628_v22 }
  0xb3   : > { %956 = vmatpush1.bf16.msra.mxu0 %v1635_v23  ;;  %1042 = vmatpush1.bf16.msra.mxu1 %v1635_v23 }
  0xb4   : > { %957 = vmatprep.subr.bf16.mxu0 %v1642_v24  ;;  %1043 = vmatprep.subr.bf16.mxu1 %v1642_v24 }
  0xb7   : > { %958 = vmatpush1.bf16.msra.mxu0 %v1649_v25  ;;  %1044 = vmatpush1.bf16.msra.mxu1 %v1649_v25 }
  0xb8   : > { %959 = vmatprep.subr.bf16.mxu0 %v1657_v27  ;;  %1045 = vmatprep.subr.bf16.mxu1 %v1657_v27 }
  0xbb   : > { %960 = vmatpush1.bf16.msra.mxu0 %v1669_v29  ;;  %1046 = vmatpush1.bf16.msra.mxu1 %v1669_v29 }
  0xbc   : > { %961 = vmatprep.subr.bf16.mxu0 %v1676_v30  ;;  %1047 = vmatprep.subr.bf16.mxu1 %v1676_v30 }
  0xbf   : > { %962 = vmatpush1.bf16.msra.mxu0 %v1683_v31  ;;  %1048 = vmatpush1.bf16.msra.mxu1 %v1683_v31 }
  0xc0   : > { %963 = vmatprep.subr.bf16.mxu0 %v1690_v32  ;;  %1049 = vmatprep.subr.bf16.mxu1 %v1690_v32 }
  0xc3   : > { %964 = vmatpush1.bf16.msra.mxu0 %v1700_v34  ;;  %1050 = vmatpush1.bf16.msra.mxu1 %v1700_v34 }
  0xc4   : > { %1261 = vmatprep.subr.msk.bf16.mxu0 %vm426_vm1, %v1704_v35  ;;  %1267 = vmatprep.subr.msk.bf16.mxu1 %vm426_vm1, %v1704_v35 }
  0xc7   : > { %976 = vmatpush2.bf16.msra.mxu0 %v1713_v37  ;;  %1062 = vmatpush2.bf16.msra.mxu1 %v1713_v37 }
  0xc8   : > { %977 = vmatprep.subr.bf16.mxu0 %v1718_v38  ;;  %1063 = vmatprep.subr.bf16.mxu1 %v1718_v38 }
  0xcb   : > { %978 = vmatpush2.bf16.msra.mxu0 %v1725_v39  ;;  %1064 = vmatpush2.bf16.msra.mxu1 %v1725_v39 }
  0xcc   : > { %979 = vmatprep.subr.bf16.mxu0 %v1732_v40  ;;  %1065 = vmatprep.subr.bf16.mxu1 %v1732_v40 }
  0xcf   : > { %980 = vmatpush2.bf16.msra.mxu0 %v1739_v41  ;;  %1066 = vmatpush2.bf16.msra.mxu1 %v1739_v41 }
  0xd2   : > { %982 = vmatmul.mubr.bf16.vlgmr.msra.gmra.mxu0 %v1356_v54  ;;  %1068 = vmatmul.mubr.bf16.vlgmr.msra.gmra.mxu1 %v1357_v55 }
 0x10e   : > { %v467_v60 = vpop.f32.mrf.mxu0  ;;  %v553_v61 = vpop.f32.mrf.mxu1 }
 0x10f   : > { %v1911_v3 = vadd.f32 %v467_v60, %v1906_v63  ;;  %v1914_v4 = vadd.f32 %v553_v61, %v1906_v63 }
 0x110   : > { %v469_v0 = vpop.f32.mrf.mxu0  ;;  %v555_v2 = vpop.f32.mrf.mxu1 }
 0x111   : > { %v1917_v6 = vadd.f32 %v469_v0, %v1908_v1  ;;  %v1920_v8 = vadd.f32 %v555_v2, %v1908_v1  ;;  %v476_v9 = vsub.f32 0.0, %v1911_v3  ;;  %v562_v10 = vsub.f32 0.0, %v1914_v4 }
 0x112   : > { %v471_v5 = vpop.f32.mrf.mxu0  ;;  %v557_v7 = vpop.f32.mrf.mxu1 }
 0x113   : > { %v477_v12 = vsub.f32 0.0, %v1917_v6  ;;  %v1926_v13 = vadd.f32 %v471_v5, %v1906_v63  ;;  %v563_v15 = vsub.f32 0.0, %v1920_v8  ;;  %v480_v17 = vmul.f32 1.442695, %v476_v9 }
 0x114   : > { %v473_v11 = vpop.f32.mrf.mxu0  ;;  %v559_v14 = vpop.f32.mrf.mxu1  ;;  %v1930_v18 = vadd.f32 %v557_v7, %v1906_v63  ;;  %v566_v20 = vmul.f32 1.442695, %v562_v10 }
 0x115   : > { %v1933_v21 = vadd.f32 %v473_v11, %v1908_v1  ;;  %v482_v22 = vmul.f32 1.442695, %v477_v12  ;;  %v478_v23 = vsub.f32 0.0, %v1926_v13  ;;  %v1937_v24 = vadd.f32 %v559_v14, %v1908_v1 }
 0x116   : > { %v568_v25 = vmul.f32 1.442695, %v563_v15  ;;  %1358 = vpow2.f32 %v480_v17  ;;  %v564_v27 = vsub.f32 0.0, %v1930_v18 }
 0x117   : > { %1360 = vpow2.f32 %v566_v20  ;;  %v479_v30 = vsub.f32 0.0, %v1933_v21  ;;  %v484_v32 = vmul.f32 1.442695, %v478_v23  ;;  %v565_v33 = vsub.f32 0.0, %v1937_v24 }
 0x118   : > { %1362 = vpow2.f32 %v482_v22  ;;  %v570_v37 = vmul.f32 1.442695, %v564_v27 }
 0x119   : > { %1364 = vpow2.f32 %v568_v25  ;;  %v486_v39 = vmul.f32 1.442695, %v479_v30  ;;  %v572_v41 = vmul.f32 1.442695, %v565_v33 }
 0x11a   : > { %1366 = vpow2.f32 %v484_v32 }
 0x11b   : > { %1368 = vpow2.f32 %v570_v37 }
 0x11c   : > { %1370 = vpow2.f32 %v486_v39 }
 0x11d   : > { %1372 = vpow2.f32 %v572_v41 }
 0x123   : > { %v1359_v54 = vpop.eup %1358 }
 0x124   : > { %v1361_v56 = vpop.eup %1360  ;;  %v488_v62 = vadd.f32 1.0, %v1359_v54 }
 0x125   : > { %v1363_v59 = vpop.eup %1362  ;;  %v574_v7 = vadd.f32 1.0, %v1361_v56 }
 0x126   : > { %v1365_v61 = vpop.eup %1364  ;;  %v489_v10 = vadd.f32 1.0, %v1363_v59 }
 0x127   : > { %v1367_v11 = vpop.eup %1366  ;;  %v575_v12 = vadd.f32 1.0, %v1365_v61 }
 0x128   : > { %v1369_v20 = vpop.eup %1368  ;;  %v490_v25 = vadd.f32 1.0, %v1367_v11 }
 0x129   : > { %v1371_v23 = vpop.eup %1370  ;;  %v576_v30 = vadd.f32 1.0, %v1369_v20 }
 0x13a   : > { %v639_v16 = vpop.f32.mrf.mxu0  ;;  %v725_v19 = vpop.f32.mrf.mxu1 }
 0x13b   : > { %v1941_v28 = vadd.f32 %v639_v16, %v1906_v63  ;;  %v1945_v31 = vadd.f32 %v725_v19, %v1906_v63 }
 0x13c   : > { %v641_v26 = vpop.f32.mrf.mxu0  ;;  %v727_v29 = vpop.f32.mrf.mxu1 }
 0x13d   : > { %v1949_v34 = vadd.f32 %v641_v26, %v1908_v1  ;;  %v1952_v35 = vadd.f32 %v727_v29, %v1908_v1  ;;  %v648_v38 = vsub.f32 0.0, %v1941_v28  ;;  %v734_v40 = vsub.f32 0.0, %v1945_v31  ;;  %v1373_v26 = vpop.eup %1372 }
 0x13e   : > { %v643_v36 = vpop.f32.mrf.mxu0  ;;  %v729_v47 = vpop.f32.mrf.mxu1  ;;  %v577_v41 = vadd.f32 1.0, %v1373_v26 }
 0x13f   : > { %v649_v42 = vsub.f32 0.0, %v1949_v34  ;;  %v1958_v43 = vadd.f32 %v643_v36, %v1906_v63  ;;  %v735_v44 = vsub.f32 0.0, %v1952_v35  ;;  %v652_v45 = vmul.f32 1.442695, %v648_v38 }
 0x140   : > { %v738_v46 = vmul.f32 1.442695, %v734_v40  ;;  %v645_v50 = vpop.f32.mrf.mxu0  ;;  %v1963_v52 = vadd.f32 %v729_v47, %v1906_v63  ;;  %v731_v58 = vpop.f32.mrf.mxu1  ;;  %v491_v38 = vadd.f32 1.0, %v1371_v23 }
 0x141   : > { %v654_v48 = vmul.f32 1.442695, %v649_v42  ;;  %v650_v49 = vsub.f32 0.0, %v1958_v43  ;;  %v740_v51 = vmul.f32 1.442695, %v735_v44  ;;  %1374 = vpow2.f32 %v652_v45 }
 0x142   : > { %1376 = vpow2.f32 %v738_v46  ;;  %v1966_v55 = vadd.f32 %v645_v50, %v1908_v1  ;;  %v736_v0 = vsub.f32 0.0, %v1963_v52  ;;  %v1974_v14 = vadd.f32 %v731_v58, %v1908_v1 }
 0x143   : > { %1378 = vpow2.f32 %v654_v48  ;;  %v656_v57 = vmul.f32 1.442695, %v650_v49 }
 0x144   : > { %1380 = vpow2.f32 %v740_v51  ;;  %v651_v9 = vsub.f32 0.0, %v1966_v55  ;;  %v742_v16 = vmul.f32 1.442695, %v736_v0  ;;  %v737_v27 = vsub.f32 0.0, %v1974_v14 }
 0x145   : > { %1382 = vpow2.f32 %v656_v57 }
 0x146   : > { %1384 = vrcp.f32 %v488_v62  ;;  %v658_v22 = vmul.f32 1.442695, %v651_v9  ;;  %v744_v44 = vmul.f32 1.442695, %v737_v27 }
 0x147   : > { %1386 = vrcp.f32 %v574_v7 }
 0x148   : > { %1388 = vrcp.f32 %v489_v10 }
 0x149   : > { %1390 = vrcp.f32 %v575_v12 }
 0x14a   : > { %1392 = vpow2.f32 %v742_v16 }
 0x14b   : > { %1394 = vpow2.f32 %v658_v22 }
 0x14c   : > { %1396 = vrcp.f32 %v490_v25 }
 0x14e   : > { %v1375_v37 = vpop.eup %1374 }
 0x14f   : > { %v1377_v40 = vpop.eup %1376  ;;  %v660_v47 = vadd.f32 1.0, %v1375_v37 }
 0x150   : > { %v1379_v42 = vpop.eup %1378  ;;  %v746_v51 = vadd.f32 1.0, %v1377_v40 }
 0x151   : > { %v1381_v46 = vpop.eup %1380  ;;  %v661_v56 = vadd.f32 1.0, %v1379_v42 }
 0x152   : > { %v1383_v58 = vpop.eup %1382  ;;  %v747_v59 = vadd.f32 1.0, %v1381_v46 }
 0x153   : > { %v662_v11 = vadd.f32 1.0, %v1383_v58 }
 0x166   : > { %v811_v53 = vpop.f32.mrf.mxu0  ;;  %v897_v2 = vpop.f32.mrf.mxu1 }
 0x167   : > { %v1969_v60 = vadd.f32 %v811_v53, %v1906_v63  ;;  %v1988_v48 = vadd.f32 %v897_v2, %v1906_v63 }
 0x168   : > { %v813_v5 = vpop.f32.mrf.mxu0  ;;  %v899_v17 = vpop.f32.mrf.mxu1 }
 0x169   : > { %v820_v15 = vsub.f32 0.0, %v1969_v60  ;;  %v1979_v32 = vadd.f32 %v813_v5, %v1908_v1  ;;  %v1992_v53 = vadd.f32 %v899_v17, %v1908_v1  ;;  %v906_v0 = vsub.f32 0.0, %v1988_v48  ;;  %v2003_v5 = vpop.eup %1384 }
 0x16a   : > { %v815_v19 = vpop.f32.mrf.mxu0  ;;  %v901_v33 = vpop.f32.mrf.mxu1 }
 0x16b   : > { %v824_v29 = vmul.f32 1.442695, %v820_v15  ;;  %v1982_v39 = vadd.f32 %v815_v19, %v1906_v63  ;;  %v821_v49 = vsub.f32 0.0, %v1979_v32  ;;  %v1996_v57 = vadd.f32 %v901_v33, %v1906_v63  ;;  %v2006_v10 = vpop.eup %1386 }
 0x16c   : > { %v817_v36 = vpop.f32.mrf.mxu0  ;;  %v903_v50 = vpop.f32.mrf.mxu1  ;;  %v907_v7 = vsub.f32 0.0, %v1992_v53  ;;  %v910_v20 = vmul.f32 1.442695, %v906_v0 }
 0x16d   : > { %1398 = vpow2.f32 %v824_v29  ;;  %v1985_v45 = vadd.f32 %v817_v36, %v1908_v1  ;;  %v822_v54 = vsub.f32 0.0, %v1982_v39  ;;  %v2000_v62 = vadd.f32 %v903_v50, %v1908_v1  ;;  %v2009_v15 = vpop.eup %1388 }
 0x16e   : > { %1400 = vrcp.f32 %v576_v30  ;;  %v826_v2 = vmul.f32 1.442695, %v821_v49  ;;  %v908_v12 = vsub.f32 0.0, %v1996_v57  ;;  %v2012_v19 = vpop.eup %1390  ;;  %v912_v23 = vmul.f32 1.442695, %v907_v7 }
 0x16f   : > { %1402 = vrcp.f32 %v491_v38  ;;  %v823_v61 = vsub.f32 0.0, %v1985_v45  ;;  %v828_v9 = vmul.f32 1.442695, %v822_v54  ;;  %v909_v17 = vsub.f32 0.0, %v2000_v62  ;;  %v1393_v22 = vpop.eup %1392 }
 0x170   : > { %1404 = vrcp.f32 %v577_v41  ;;  %v1395_v25 = vpop.eup %1394  ;;  %v914_v26 = vmul.f32 1.442695, %v908_v12  ;;  %v748_v33 = vadd.f32 1.0, %v1393_v22 }
 0x171   : > { %1406 = vpow2.f32 %v744_v44  ;;  %v830_v16 = vmul.f32 1.442695, %v823_v61  ;;  %v2014_v27 = vpop.eup %1396  ;;  %v916_v29 = vmul.f32 1.442695, %v909_v17  ;;  %v663_v37 = vadd.f32 1.0, %v1395_v25 }
 0x172   : > { %1408 = vrcp.f32 %v660_v47 }
 0x173   : > { %1410 = vrcp.f32 %v746_v51 }
 0x174   : > { %1412 = vrcp.f32 %v661_v56 }
 0x175   : > { %1414 = vrcp.f32 %v747_v59 }
 0x176   : > { %1416 = vpow2.f32 %v826_v2 }
 0x177   : > { %1418 = vpow2.f32 %v828_v9 }
 0x178   : > { %1420 = vrcp.f32 %v662_v11 }
 0x179   : > { %1422 = vpow2.f32 %v830_v16 }
 0x17a   : > { %v1399_v30 = vpop.eup %1398  ;;  %1424 = vpow2.f32 %v910_v20 }
 0x17b   : > { %v2016_v36 = vpop.eup %1400  ;;  %1426 = vpow2.f32 %v912_v23  ;;  %v832_v47 = vadd.f32 1.0, %v1399_v30 }
 0x17c   : > { %v2018_v41 = vpop.eup %1402  ;;  %1428 = vpow2.f32 %v914_v26 }
 0x17d   : > { %v2026_v46 = vpop.eup %1404  ;;  %1430 = vpow2.f32 %v916_v29 }
 0x17e   : > { %v1407_v51 = vpop.eup %1406  ;;  %1432 = vrcp.f32 %v748_v33 }
 0x17f   : > { %v2033_v59 = vpop.eup %1408  ;;  %1434 = vrcp.f32 %v663_v37 }
 0x180   : > { %v2038_v7 = vpop.eup %1410  ;;  %1436 = vrcp.f32 %v832_v47 }
 0x181   : > { %v2044_v17 = vpop.eup %1412 }
 0x182   : > { %v2050_v26 = vpop.eup %1414 }
 0x183   : > { %v1417_v37 = vpop.eup %1416 }
 0x192   : > { %v983_v38 = vpop.f32.mrf.mxu0  ;;  %v1069_v40 = vpop.f32.mrf.mxu1 }
 0x193   : > { %v2021_v42 = vadd.f32 %v983_v38, %v1906_v63  ;;  %v2024_v44 = vadd.f32 %v1069_v40, %v1906_v63 }
 0x194   : > { %v985_v49 = vpop.f32.mrf.mxu0  ;;  %v1071_v50 = vpop.f32.mrf.mxu1 }
 0x195   : > { %v992_v54 = vsub.f32 0.0, %v2021_v42  ;;  %v1078_v56 = vsub.f32 0.0, %v2024_v44  ;;  %v2031_v58 = vadd.f32 %v985_v49, %v1908_v1  ;;  %v2036_v61 = vadd.f32 %v1071_v50, %v1908_v1 }
 0x196   : > { %v987_v0 = vpop.f32.mrf.mxu0  ;;  %v1073_v2 = vpop.f32.mrf.mxu1 }
 0x197   : > { %v996_v9 = vmul.f32 1.442695, %v992_v54  ;;  %v1082_v11 = vmul.f32 1.442695, %v1078_v56  ;;  %v993_v12 = vsub.f32 0.0, %v2031_v58  ;;  %v2042_v16 = vadd.f32 %v987_v0, %v1906_v63 }
 0x198   : > { %v1079_v20 = vsub.f32 0.0, %v2036_v61  ;;  %v2048_v22 = vadd.f32 %v1073_v2, %v1906_v63  ;;  %v989_v23 = vpop.f32.mrf.mxu0  ;;  %v1075_v25 = vpop.f32.mrf.mxu1 }
 0x199   : > { %1438 = vpow2.f32 %v996_v9  ;;  %v998_v29 = vmul.f32 1.442695, %v993_v12  ;;  %v994_v30 = vsub.f32 0.0, %v2042_v16  ;;  %v2054_v33 = vadd.f32 %v989_v23, %v1908_v1  ;;  %v1419_v63 = vpop.eup %1418 }
 0x19a   : > { %2131 = vst [vmem:[#allocation3_spill] sm:$0xff] %v2048_v22  ;;  %1440 = vpow2.f32 %v1082_v11  ;;  %v1084_v38 = vmul.f32 1.442695, %v1079_v20  ;;  %v1080_v40 = vsub.f32 0.0, %v2048_v22  ;;  %v2058_v47 = vadd.f32 %v1075_v25, %v1908_v1  ;;  %v1421_v54 = vpop.eup %1420 }
 0x19b   : > { %2132 = vst [vmem:[#allocation4_spill] sm:$0xff] %v2054_v33  ;;  %1442 = vpow2.f32 %v998_v29  ;;  %v1000_v49 = vmul.f32 1.442695, %v994_v30  ;;  %v995_v50 = vsub.f32 0.0, %v2054_v33  ;;  %v1423_v2 = vpop.eup %1422  ;;  %v833_v9 = vadd.f32 1.0, %v1417_v37 }
 0x19c   : > { %1444 = vpow2.f32 %v1084_v38  ;;  %v1086_v56 = vmul.f32 1.442695, %v1080_v40  ;;  %v1081_v0 = vsub.f32 0.0, %v2058_v47  ;;  %v1425_v12 = vpop.eup %1424  ;;  %v834_v20 = vadd.f32 1.0, %v1419_v63 }
 0x19d   : > { %1446 = vpow2.f32 %v1000_v49  ;;  %v1002_v11 = vmul.f32 1.442695, %v995_v50  ;;  %v1427_v1 = vpop.eup %1426  ;;  %v749_v25 = vadd.f32 1.0, %v1407_v51  ;;  %v835_v30 = vadd.f32 1.0, %v1423_v2 }
 0x19e   : > { %1448 = vpow2.f32 %v1086_v56  ;;  %v1088_v23 = vmul.f32 1.442695, %v1081_v0  ;;  %v1429_v29 = vpop.eup %1428  ;;  %v918_v22 = vadd.f32 1.0, %v1425_v12  ;;  %v919_v40 = vadd.f32 1.0, %v1427_v1 }
 0x19f   : > { %1450 = vpow2.f32 %v1002_v11  ;;  %v1431_v33 = vpop.eup %1430  ;;  %v920_v49 = vadd.f32 1.0, %v1429_v29  ;;  %v496_v63 = vmul.f32 %v2003_v5, %v1911_v3  ;;  %v582_v51 = vmul.f32 %v2006_v10, %v1914_v4 }
 0x1a0   : > { %1452 = vpow2.f32 %v1088_v23  ;;  %v2062_v38 = vpop.eup %1432  ;;  %v921_v50 = vadd.f32 1.0, %v1431_v33  ;;  %v583_v4 = vmul.f32 %v2012_v19, %v1920_v8  ;;  %v668_v5 = vmul.f32 %v2033_v59, %v1941_v28 }
 0x1a1   : > { %1454 = vrcp.f32 %v833_v9  ;;  %v1435_v37 = vpop.eup %1434  ;;  %v586_v12 = vadd.f32 %v582_v51, %v496_v63  ;;  %v498_v33 = vmul.f32 %v2014_v27, %v1926_v13  ;;  %v584_v1 = vmul.f32 %v2016_v36, %v1930_v18 }
 0x1a2   : > { %1456 = vrcp.f32 %v834_v20  ;;  %v1437_v56 = vpop.eup %1436  ;;  %v497_v20 = vmul.f32 %v2009_v15, %v1917_v6  ;;  %v669_v8 = vmul.f32 %v2044_v17, %v1949_v34  ;;  %v585_v59 = vmul.f32 %v2026_v46, %v1937_v24 }
 0x1a3   : > { %1458 = vrcp.f32 %v749_v25  ;;  %v499_v25 = vmul.f32 %v2018_v41, %v1933_v21  ;;  %v670_v13 = vmul.f32 %v1421_v54, %v1958_v43  ;;  %v672_v29 = vadd.f32 %v668_v5, %v586_v12 }
 0x1a4   : > { %1460 = vrcp.f32 %v835_v30  ;;  %v587_v36 = vadd.f32 %v583_v4, %v497_v20  ;;  %v588_v21 = vadd.f32 %v584_v1, %v498_v33  ;;  %v671_v41 = vmul.f32 %v1435_v37, %v1966_v55 }
 0x1a5   : > { %1462 = vrcp.f32 %v918_v22  ;;  %v840_v43 = vmul.f32 %v1437_v56, %v1969_v60  ;;  %v589_v54 = vadd.f32 %v585_v59, %v499_v25  ;;  %v755_v55 = vmul.f32 %v2050_v26, %v1952_v35 }
 0x1a6   : > { %v1439_v0 = vpop.eup %1438  ;;  %1464 = vrcp.f32 %v919_v40  ;;  %v673_v24 = vadd.f32 %v669_v8, %v587_v36  ;;  %v674_v63 = vadd.f32 %v670_v13, %v588_v21 }
 0x1a7   : > { %v1441_v2 = vpop.eup %1440  ;;  %1466 = vrcp.f32 %v920_v49  ;;  %v1004_v9 = vadd.f32 1.0, %v1439_v0  ;;  %v754_v49 = vmul.f32 %v2038_v7, %v1945_v31  ;;  %v756_v31 = vmul.f32 %v2062_v38, %v1963_v52 }
 0x1a8   : > { %v1443_v11 = vpop.eup %1442  ;;  %1468 = vrcp.f32 %v921_v50  ;;  %v1090_v23 = vadd.f32 1.0, %v1441_v2  ;;  %v675_v7 = vadd.f32 %v671_v41, %v589_v54  ;;  %v759_v56 = vadd.f32 %v755_v55, %v673_v24 }
 0x1a9   : > { %v1445_v3 = vpop.eup %1444  ;;  %1470 = vrcp.f32 %v1004_v9  ;;  %v1005_v10 = vadd.f32 1.0, %v1443_v11  ;;  %v758_v50 = vadd.f32 %v754_v49, %v672_v29  ;;  %v760_v12 = vadd.f32 %v756_v31, %v674_v63 }
 0x1aa   : > { %v1447_v22 = vpop.eup %1446  ;;  %1472 = vrcp.f32 %v1090_v23  ;;  %v1091_v6 = vadd.f32 1.0, %v1445_v3 }
 0x1ab   : > { %v1449_v15 = vpop.eup %1448  ;;  %1474 = vrcp.f32 %v1005_v10  ;;  %v1006_v28 = vadd.f32 1.0, %v1447_v22  ;;  %v844_v9 = vadd.f32 %v840_v43, %v758_v50 }
 0x1ac   : > { %v1451_v19 = vpop.eup %1450  ;;  %1476 = vrcp.f32 %v1091_v6  ;;  %v1092_v27 = vadd.f32 1.0, %v1449_v15 }
 0x1ad   : > { %v1453_v18 = vpop.eup %1452  ;;  %1478 = vrcp.f32 %v1006_v28  ;;  %v1007_v30 = vadd.f32 1.0, %v1451_v19 }
 0x1ae   : > { %v1455_v40 = vpop.eup %1454  ;;  %1480 = vrcp.f32 %v1092_v27  ;;  %v1093_v34 = vadd.f32 1.0, %v1453_v18 }
 0x1af   : > { %v1457_v17 = vpop.eup %1456  ;;  %1482 = vrcp.f32 %v1007_v30  ;;  %v841_v37 = vmul.f32 %v1455_v40, %v1979_v32  ;;  %v2134_v30 = vld [vmem:[#allocation4_spill] sm:$0xff] }
 0x1b0   : > { %v1459_v46 = vpop.eup %1458  ;;  %1484 = vrcp.f32 %v1093_v34  ;;  %v842_v2 = vmul.f32 %v1457_v17, %v1982_v39 }
 0x1b1   : > { %v1461_v51 = vpop.eup %1460  ;;  %v757_v20 = vmul.f32 %v1459_v46, %v1974_v14  ;;  %v845_v23 = vadd.f32 %v841_v37, %v759_v56 }
 0x1b2   : > { %v1463_v0 = vpop.eup %1462  ;;  %v843_v35 = vmul.f32 %v1461_v51, %v1985_v45  ;;  %v846_v3 = vadd.f32 %v842_v2, %v760_v12 }
 0x1b3   : > { %v1465_v60 = vpop.eup %1464  ;;  %v926_v32 = vmul.f32 %v1463_v0, %v1988_v48  ;;  %v761_v38 = vadd.f32 %v757_v20, %v675_v7 }
 0x1b4   : > { %v1467_v11 = vpop.eup %1466  ;;  %v927_v5 = vmul.f32 %v1465_v60, %v1992_v53 }
 0x1b5   : > { %v1469_v26 = vpop.eup %1468  ;;  %v930_v4 = vadd.f32 %v926_v32, %v844_v9  ;;  %v928_v33 = vmul.f32 %v1467_v11, %v1996_v57  ;;  %v847_v14 = vadd.f32 %v843_v35, %v761_v38 }
 0x1b6   : > { %v1471_v52 = vpop.eup %1470  ;;  %v931_v45 = vadd.f32 %v927_v5, %v845_v23  ;;  %v929_v28 = vmul.f32 %v1469_v26, %v2000_v62 }
 0x1b7   : > { %v1473_v39 = vpop.eup %1472  ;;  %v1012_v10 = vmul.f32 %v1471_v52, %v2021_v42  ;;  %v932_v8 = vadd.f32 %v928_v33, %v846_v3 }
 0x1b8   : > { %v1475_v22 = vpop.eup %1474  ;;  %v1098_v48 = vmul.f32 %v1473_v39, %v2024_v44  ;;  %v933_v27 = vadd.f32 %v929_v28, %v847_v14 }
 0x1b9   : > { %v1477_v1 = vpop.eup %1476  ;;  %v1016_v6 = vadd.f32 %v1012_v10, %v930_v4  ;;  %v1013_v15 = vmul.f32 %v1475_v22, %v2031_v58  ;;  %v2133_v58 = vld [vmem:[#allocation3_spill] sm:$0xff] }
 0x1ba   : > { %v1479_v25 = vpop.eup %1478  ;;  %v1099_v59 = vmul.f32 %v1477_v1, %v2036_v61 }
 0x1bb   : > { %v1481_v53 = vpop.eup %1480  ;;  %v1102_v19 = vadd.f32 %v1098_v48, %v1016_v6  ;;  %v1017_v42 = vadd.f32 %v1013_v15, %v931_v45  ;;  %v1014_v57 = vmul.f32 %v1479_v25, %v2042_v16 }
 0x1bc   : > { %v1483_v13 = vpop.eup %1482  ;;  %v1100_v29 = vmul.f32 %v1481_v53, %v2133_v58 }
 0x1bd   : > { %v1485_v18 = vpop.eup %1484  ;;  %v1103_v44 = vadd.f32 %v1099_v59, %v1017_v42  ;;  %v1018_v36 = vadd.f32 %v1014_v57, %v932_v8  ;;  %v1015_v40 = vmul.f32 %v1483_v13, %v2134_v30  ;;  %v1106_v21 = vmul.f32 0.125, %v1102_v19 }
 0x1be   : > { %v1101_v17 = vmul.f32 %v1485_v18, %v2058_v47 }
 0x1bf   : > { %v1107_v41 = vmul.f32 0.125, %v1103_v44  ;;  %v1104_v62 = vadd.f32 %v1100_v29, %v1018_v36  ;;  %v1019_v34 = vadd.f32 %v1015_v40, %v933_v27 }
 0x1c1   : > { %v1276_v61 = vpack.c.bf16 %v1107_v41, %v1106_v21  ;;  %v1105_v16 = vadd.f32 %v1101_v17, %v1019_v34  ;;  %v1108_v49 = vmul.f32 0.125, %v1104_v62 }
 0x1c3   : > { %1122 = vst [vmem:[%s270_s5] sm:$0xff] %v1276_v61  ;;  %v1109_v24 = vmul.f32 0.125, %v1105_v16 }
 0x1c5   : > { %v1277_v43 = vpack.c.bf16 %v1109_v24, %v1108_v49 }
 0x1c7   : > { %1123 = vst [vmem:[%s270_s5 + $0x8] sm:$0xff] %v1277_v43 }
 0x1c8 PF: > { %p10_p9 = scmp.ge.s32.totalorder %s1547_s16, 4   ;;  %s2135_s12 = smov %s1504_s13 }
 0x1c9   : > { %s2136_s13 = smov %s1556_s19  ;;  %s2137_s14 = smov %s1547_s16 }
 0x1ca   :  { %12 = sbr.rel (!%p10_p9) target bundleno = 2 (0x2), region = 112 }

// kernel: stmap_feature_extractor.6
= control target key start
LH: loop header
LB: loop body
LE: loop exit
PB: predicated region body
PF: predicated region fallthrough
CT: control target
= control target key end

     0   :  { %s684_s12 = smov 0   ;;  %s789_s0 = inlined_call_operand.vmem [shape: bf16[128,144], index: 0, kind: input, shape index: {}]   ;;  %s790_s1 = inlined_call_operand.vmem [shape: bf16[144,32], index: 1, kind: input, shape index: {}]   ;;  %s791_s2 = inlined_call_operand.vmem [shape: f32[1,32], index: 2, kind: input, shape index: {}]   ;;  %s792_s3 = inlined_call_operand.vmem [shape: bf16[128,32], index: 3, kind: output, shape index: {}]  }
   0x1 LB: > { %s524_s13 = sadd.s32 4294967295, %s661_s12   ;;  %p528_p0 = scmp.ge.s32.totalorder %s661_s12, 1  ;;  %s661_s12 = sphi %s684_s12, %s13_s12  }
   0x2   : > { %p139_p1 = scmp.lt.s32.totalorder %s661_s12, 3 }
   0x4   : > { %p140_p2 = pnand %p528_p0, %p139_p1 }
   0x5   : > { %s529_s16 = sshll.u32 (!%p140_p2), %s524_s13, 3 }
   0x6   : > { %143 = sbr.rel (%p140_p2) target bundleno = 295 (0x127), region = 32  ;;  %p165_p3 = scmp.lt.s32.totalorder (!%p140_p2), %s529_s16, 15 }
   0xb   : > { %v602_v0 = vld [vmem:[%s790_s1 + $0x38] sm:$0xff]   ;;  %v663_v1 = vmov 0   ;;  %v603_v2 = vld [vmem:[%s790_s1 + $0x30] sm:$0xff]   ;;  %s794_s16 = smov (!%p165_p3, %s529_s16), 15  ;;  %v604_v3 = vld [vmem:[%s790_s1 + $0x28] sm:$0xff]   ;;  %vm301_vm0 = vcmask 130048  }
   0xc   : > { %314 = vmatprep.subr.bf16.mxu0 %v663_v1  ;;  %575 = vmatprep.subr.bf16.mxu1 %v663_v1  ;;  %s566_s21 = sshll.u32 %s794_s16, 3  ;;  %v605_v4 = vld [vmem:[%s790_s1 + $0x20] sm:$0xff]   ;;  %v606_v7 = vld [vmem:[%s790_s1 + $0x18] sm:$0xff]   ;;  %v607_v8 = vld [vmem:[%s790_s1 + $0x10] sm:$0xff]   ;;  %s533_s13 = sshll.u32 %s794_s16, 2  ;;  %vm459_vm1 = vcmask 257024  }
   0xd   : > { %315 = vmatpush1.bf16.msra.mxu0 %v602_v0  ;;  %584 = vmatpush1.bf16.msra.mxu1 %v602_v0  ;;  %s707_s24 = scalar_lea.vmem %s789_s0, %s566_s21  ;;  %v608_v9 = vld [vmem:[%s790_s1 + $0x8] sm:$0xff]   ;;  %v609_v10 = vld [vmem:[%s790_s1] sm:$0xff]   ;;  %s175_s17 = scalar_lea.vmem %s792_s3, %s533_s13 }
   0xe   : > { %316 = vmatprep.subr.bf16.mxu0 %v663_v1  ;;  %576 = vmatprep.subr.bf16.mxu1 %v663_v1  ;;  %v613_v5 = vld [vmem:[%s707_s24 + $0x4] ss:$8 sps:$4 sm:$0xff]   ;;  %v611_v12 = vld [vmem:[%s707_s24] ss:$8 sps:$4 sm:$0xff]   ;;  %v617_v14 = vld [vmem:[%s707_s24 + $0x14] ss:$8 sps:$4 sm:$0xff]  }
   0xf   : > { %v616_v6 = vld [vmem:[%s707_s24 + $0x24] ss:$8 sps:$4 sm:$0xff]   ;;  %552 = vmatprep.mubr.msk.bf16.mxu0 %vm301_vm0, %v613_v5  ;;  %v614_v13 = vld [vmem:[%s707_s24 + $0x20] ss:$8 sps:$4 sm:$0xff]   ;;  %v619_v15 = vld [vmem:[%s707_s24 + $0x34] ss:$8 sps:$4 sm:$0xff]  }
  0x10   : > { %554 = vmatprep.mubr.msk.bf16.mxu1 %vm301_vm0, %v616_v6  ;;  %v610_v11 = vld [vmem:[%s790_s1 + $0x40] sm:$0xff]   ;;  %v621_v16 = vld [vmem:[%s707_s24 + $0x10] ss:$8 sps:$4 sm:$0xff]  }
  0x11   : > { %317 = vmatpush1.bf16.msra.mxu0 %v603_v2  ;;  %585 = vmatpush1.bf16.msra.mxu1 %v603_v2  ;;  %v622_v17 = vld [vmem:[%s707_s24 + $0x30] ss:$8 sps:$4 sm:$0xff]   ;;  %v534_v18 = vld [vmem:[%s791_s2] ss:$0 sm:$0xff] }
  0x12   : > { %318 = vmatprep.subr.bf16.mxu0 %v663_v1  ;;  %577 = vmatprep.subr.bf16.mxu1 %v663_v1 }
  0x15   : > { %319 = vmatpush1.bf16.msra.mxu0 %v604_v3  ;;  %586 = vmatpush1.bf16.msra.mxu1 %v604_v3 }
  0x16   : > { %320 = vmatprep.subr.bf16.mxu0 %v663_v1  ;;  %578 = vmatprep.subr.bf16.mxu1 %v663_v1 }
  0x19   : > { %321 = vmatpush1.bf16.msra.mxu0 %v605_v4  ;;  %587 = vmatpush1.bf16.msra.mxu1 %v605_v4 }
  0x1a   : > { %322 = vmatprep.subr.bf16.mxu0 %v663_v1  ;;  %579 = vmatprep.subr.bf16.mxu1 %v663_v1 }
  0x1d   : > { %323 = vmatpush1.bf16.msra.mxu0 %v606_v7  ;;  %588 = vmatpush1.bf16.msra.mxu1 %v606_v7 }
  0x1e   : > { %324 = vmatprep.subr.bf16.mxu0 %v663_v1  ;;  %580 = vmatprep.subr.bf16.mxu1 %v663_v1 }
  0x21   : > { %325 = vmatpush1.bf16.msra.mxu0 %v607_v8  ;;  %589 = vmatpush1.bf16.msra.mxu1 %v607_v8 }
  0x22   : > { %326 = vmatprep.subr.bf16.mxu0 %v663_v1  ;;  %581 = vmatprep.subr.bf16.mxu1 %v663_v1 }
  0x25   : > { %327 = vmatpush1.bf16.msra.mxu0 %v608_v9  ;;  %590 = vmatpush1.bf16.msra.mxu1 %v608_v9 }
  0x26   : > { %328 = vmatprep.subr.bf16.mxu0 %v663_v1  ;;  %582 = vmatprep.subr.bf16.mxu1 %v663_v1 }
  0x29   : > { %329 = vmatpush1.bf16.msra.mxu0 %v609_v10  ;;  %591 = vmatpush1.bf16.msra.mxu1 %v609_v10 }
  0x2a   : > { %344 = vmatprep.subr.bf16.mxu0 %v663_v1  ;;  %583 = vmatprep.subr.bf16.mxu1 %v663_v1 }
  0x2d   : > { %345 = vmatpush2.bf16.msra.mxu0 %v610_v11  ;;  %592 = vmatpush2.bf16.msra.mxu1 %v610_v11 }
  0x30   : > { %347 = vmatmul.mubr.bf16.vlgmr.msra.gmra.mxu0 %v611_v12  ;;  %363 = vmatmul.mubr.bf16.vlgmr.msra.gmra.mxu1 %v614_v13 }
  0x31   : > { %553 = vmatprep.mubr.msk.bf16.mxu0 %vm301_vm0, %v617_v14  ;;  %555 = vmatprep.mubr.msk.bf16.mxu1 %vm301_vm0, %v619_v15 }
  0x38   : > { %355 = vmatmul.mubr.bf16.gmra.mxu0 %v621_v16  ;;  %371 = vmatmul.mubr.bf16.gmra.mxu1 %v622_v17 }
  0xf0   : > { %v348_v19 = vpop.f32.mrf.mxu0  ;;  %v364_v20 = vpop.f32.mrf.mxu1 }
  0xf1   : > { %v742_v21 = vadd.f32 %v534_v18, %v348_v19  ;;  %v744_v22 = vadd.f32 %v534_v18, %v364_v20 }
  0xf2   : > { %v350_v23 = vpop.f32.mrf.mxu0  ;;  %v366_v24 = vpop.f32.mrf.mxu1 }
  0xf3   : > { %v379_v25 = vsub.f32 0.0, %v742_v21  ;;  %v383_v26 = vsub.f32 0.0, %v744_v22 }
  0xf4   : > { %v351_v27 = vpop.f32.mrf.mxu0  ;;  %v367_v28 = vpop.f32.mrf.mxu1 }
  0xf5   : > { %v387_v29 = vmul.f32 1.442695, %v379_v25  ;;  %v395_v30 = vmul.f32 1.442695, %v383_v26  ;;  %v748_v31 = vadd.f32 %v534_v18, %v351_v27  ;;  %v750_v32 = vadd.f32 %v534_v18, %v367_v28 }
  0xf6   : > { %v353_v33 = vpop.f32.mrf.mxu0  ;;  %v369_v34 = vpop.f32.mrf.mxu1 }
  0xf7   : > { %623 = vpow2.f32 %v387_v29  ;;  %v380_v35 = vsub.f32 0.0, %v748_v31  ;;  %v384_v36 = vsub.f32 0.0, %v750_v32 }
  0xf8   : > { %625 = vpow2.f32 %v395_v30  ;;  %v356_v37 = vpop.f32.mrf.mxu0  ;;  %v372_v38 = vpop.f32.mrf.mxu1 }
  0xf9   : > { %v389_v39 = vmul.f32 1.442695, %v380_v35  ;;  %v397_v40 = vmul.f32 1.442695, %v384_v36  ;;  %v754_v41 = vadd.f32 %v534_v18, %v356_v37  ;;  %v756_v42 = vadd.f32 %v534_v18, %v372_v38 }
  0xfa   : > { %v358_v43 = vpop.f32.mrf.mxu0  ;;  %v374_v44 = vpop.f32.mrf.mxu1 }
  0xfb   : > { %627 = vpow2.f32 %v389_v39  ;;  %v381_v45 = vsub.f32 0.0, %v754_v41  ;;  %v385_v46 = vsub.f32 0.0, %v756_v42 }
  0xfc   : > { %629 = vpow2.f32 %v397_v40  ;;  %v359_v47 = vpop.f32.mrf.mxu0  ;;  %v375_v48 = vpop.f32.mrf.mxu1 }
  0xfd   : > { %v391_v49 = vmul.f32 1.442695, %v381_v45  ;;  %v399_v50 = vmul.f32 1.442695, %v385_v46  ;;  %v760_v51 = vadd.f32 %v534_v18, %v359_v47  ;;  %v762_v52 = vadd.f32 %v534_v18, %v375_v48 }
  0xfe   : > { %v361_v53 = vpop.f32.mrf.mxu0  ;;  %v377_v54 = vpop.f32.mrf.mxu1 }
  0xff   : > { %631 = vpow2.f32 %v391_v49  ;;  %v382_v55 = vsub.f32 0.0, %v760_v51  ;;  %v386_v56 = vsub.f32 0.0, %v762_v52 }
 0x100   : > { %633 = vpow2.f32 %v399_v50 }
 0x101   : > { %v393_v57 = vmul.f32 1.442695, %v382_v55  ;;  %v401_v58 = vmul.f32 1.442695, %v386_v56 }
 0x103   : > { %635 = vpow2.f32 %v393_v57 }
 0x104   : > { %v624_v59 = vpop.eup %623  ;;  %637 = vpow2.f32 %v401_v58 }
 0x105   : > { %v626_v60 = vpop.eup %625  ;;  %v403_v61 = vadd.f32 1.0, %v624_v59 }
 0x106   : > { %v407_v62 = vadd.f32 1.0, %v626_v60 }
 0x107   : > { %639 = vrcp.f32 %v403_v61 }
 0x108   : > { %v628_v63 = vpop.eup %627  ;;  %641 = vrcp.f32 %v407_v62 }
 0x109   : > { %v630_v0 = vpop.eup %629  ;;  %v404_v1 = vadd.f32 1.0, %v628_v63 }
 0x10a   : > { %v408_v2 = vadd.f32 1.0, %v630_v0 }
 0x10b   : > { %643 = vrcp.f32 %v404_v1 }
 0x10c   : > { %v632_v3 = vpop.eup %631  ;;  %645 = vrcp.f32 %v408_v2 }
 0x10d   : > { %v634_v4 = vpop.eup %633  ;;  %v405_v5 = vadd.f32 1.0, %v632_v3 }
 0x10e   : > { %v409_v6 = vadd.f32 1.0, %v634_v4 }
 0x10f   : > { %647 = vrcp.f32 %v405_v5 }
 0x110   : > { %v636_v7 = vpop.eup %635  ;;  %649 = vrcp.f32 %v409_v6 }
 0x111   : > { %v638_v8 = vpop.eup %637  ;;  %v406_v9 = vadd.f32 1.0, %v636_v7 }
 0x112   : > { %v410_v10 = vadd.f32 1.0, %v638_v8 }
 0x113   : > { %651 = vrcp.f32 %v406_v9 }
 0x114   : > { %v640_v11 = vpop.eup %639  ;;  %653 = vrcp.f32 %v410_v10 }
 0x115   : > { %v642_v12 = vpop.eup %641  ;;  %v419_v13 = vmul.f32 %v640_v11, %v742_v21 }
 0x116   : > { %v423_v14 = vmul.f32 %v642_v12, %v744_v22 }
 0x117   : > { %v567_v15 = vpack.c.bf16 %v419_v13, %v419_v13 }
 0x118   : > { %v644_v16 = vpop.eup %643  ;;  %v571_v17 = vpack.c.bf16 %v423_v14, %v423_v14 }
 0x119   : > { %v646_v18 = vpop.eup %645  ;;  %460 = vst.msk [vmem:[%s175_s17] sm:$0xf] %vm459_vm1, %v567_v15  ;;  %v420_v19 = vmul.f32 %v644_v16, %v748_v31 }
 0x11a   : > { %464 = vst.msk [vmem:[%s175_s17 + $0x10] sm:$0xf] %vm459_vm1, %v571_v17  ;;  %v424_v20 = vmul.f32 %v646_v18, %v750_v32 }
 0x11b   : > { %v568_v21 = vpack.c.bf16 %v420_v19, %v420_v19 }
 0x11c   : > { %v648_v23 = vpop.eup %647  ;;  %v572_v24 = vpack.c.bf16 %v424_v20, %v424_v20 }
 0x11d   : > { %v650_v25 = vpop.eup %649  ;;  %461 = vst.msk [vmem:[%s175_s17 + $0x4] sm:$0xf] %vm459_vm1, %v568_v21  ;;  %v421_v22 = vmul.f32 %v648_v23, %v754_v41 }
 0x11e   : > { %465 = vst.msk [vmem:[%s175_s17 + $0x14] sm:$0xf] %vm459_vm1, %v572_v24  ;;  %v425_v26 = vmul.f32 %v650_v25, %v756_v42 }
 0x11f   : > { %v569_v27 = vpack.c.bf16 %v421_v22, %v421_v22 }
 0x120   : > { %v652_v28 = vpop.eup %651  ;;  %v573_v29 = vpack.c.bf16 %v425_v26, %v425_v26 }
 0x121   : > { %v654_v30 = vpop.eup %653  ;;  %462 = vst.msk [vmem:[%s175_s17 + $0x8] sm:$0xf] %vm459_vm1, %v569_v27  ;;  %v422_v31 = vmul.f32 %v652_v28, %v760_v51 }
 0x122   : > { %466 = vst.msk [vmem:[%s175_s17 + $0x18] sm:$0xf] %vm459_vm1, %v573_v29  ;;  %v426_v32 = vmul.f32 %v654_v30, %v762_v52 }
 0x123   : > { %v570_v33 = vpack.c.bf16 %v422_v31, %v422_v31 }
 0x124   : > { %v574_v34 = vpack.c.bf16 %v426_v32, %v426_v32 }
 0x125   : > { %463 = vst.msk [vmem:[%s175_s17 + $0xc] sm:$0xf] %vm459_vm1, %v570_v33 }
 0x126   : > { %467 = vst.msk [vmem:[%s175_s17 + $0x1c] sm:$0xf] %vm459_vm1, %v574_v34 }
 0x127 PF: > { %s13_s12 = sadd.s32 1, %s661_s12  }
 0x128   : > { %p10_p4 = scmp.ge.s32.totalorder %s13_s12, 4  }
 0x12a   :  { %12 = sbr.rel (!%p10_p4) target bundleno = 1 (0x1), region = 62 }

// kernel: stmap_feature_extractor.7
= control target key start
LH: loop header
LB: loop body
LE: loop exit
PB: predicated region body
PF: predicated region fallthrough
CT: control target
= control target key end

     0   :  { %v390_v1 = vmov 0.0   ;;  %vm391_vm0 = vmmov 0   ;;  %vm185_vm1 = vcmask 261120   ;;  %vm291_vm2 = vcmask 519168   ;;  %s484_s1 = inlined_call_operand.vmem [shape: bf16[288,64], index: 1, kind: input, shape index: {}]   ;;  %s485_s0 = inlined_call_operand.vmem [shape: bf16[16,288], index: 0, kind: input, shape index: {}]   ;;  %s486_s2 = inlined_call_operand.vmem [shape: f32[1,64], index: 2, kind: input, shape index: {}]   ;;  %s487_s3 = inlined_call_operand.vmem [shape: bf16[16,64], index: 3, kind: output, shape index: {}]  }
   0x1   :  { %v360_v0 = vld [vmem:[%s484_s1 + $0x78] sm:$0xff]   ;;  %350 = vmatprep.subr.bf16.mxu1 %v390_v1  ;;  %354 = vmatprep.mubr.msk.bf16.mxu1 %vm391_vm0, %v390_v1  ;;  %v362_v3 = vld [vmem:[%s484_s1 + $0x70] sm:$0xff]   ;;  %v364_v5 = vld [vmem:[%s484_s1 + $0x68] sm:$0xff]  }
   0x2   :  { %v361_v2 = vld [vmem:[%s484_s1 + $0x38] sm:$0xff]   ;;  %325 = vmatprep.subr.bf16.mxu0 %v360_v0  ;;  %v363_v4 = vld [vmem:[%s484_s1 + $0x30] sm:$0xff]   ;;  %v365_v6 = vld [vmem:[%s484_s1 + $0x28] sm:$0xff]  }
   0x3   :  { %326 = vmatpush3.bf16.msra.mxu0 %v361_v2  ;;  %v366_v7 = vld [vmem:[%s484_s1 + $0x60] sm:$0xff]   ;;  %v368_v9 = vld [vmem:[%s484_s1 + $0x58] sm:$0xff]   ;;  %v374_v10 = vld [vmem:[%s484_s1 + $0x88] sm:$0xff]  }
   0x4   :  { %327 = vmatprep.subr.bf16.mxu0 %v362_v3  ;;  %v367_v8 = vld [vmem:[%s484_s1 + $0x20] sm:$0xff]   ;;  %v369_v11 = vld [vmem:[%s484_s1 + $0x18] sm:$0xff]   ;;  %v370_v12 = vld [vmem:[%s484_s1 + $0x50] sm:$0xff]   ;;  %351 = vmatpush3.bf16.msra.mxu1 %v374_v10 }
   0x5   :  { %352 = vmatprep.subr.bf16.mxu1 %v390_v1  ;;  %v377_v13 = vld [vmem:[%s484_s1 + $0x80] sm:$0xff]   ;;  %v371_v14 = vld [vmem:[%s484_s1 + $0x10] sm:$0xff]   ;;  %v372_v16 = vld [vmem:[%s484_s1 + $0x48] sm:$0xff]  }
   0x6   :  { %v380_v15 = vld [vmem:[%s485_s0 + $0x4] ss:$12 sps:$4 sm:$0xff]   ;;  %v381_v17 = vld [vmem:[%s485_s0 + $0x8] ss:$12 sps:$4 sm:$0xff]   ;;  %v378_v21 = vld [vmem:[%s485_s0] ss:$12 sps:$4 sm:$0xff]  }
   0x7   :  { %328 = vmatpush3.bf16.msra.mxu0 %v363_v4  ;;  %221 = vmatprep.mubr.bf16.mxu0 %v380_v15  ;;  %v373_v18 = vld [vmem:[%s484_s1 + $0x8] sm:$0xff]   ;;  %v375_v19 = vld [vmem:[%s484_s1 + $0x40] sm:$0xff]  }
   0x8   :  { %329 = vmatprep.subr.bf16.mxu0 %v364_v5  ;;  %353 = vmatpush3.bf16.msra.mxu1 %v377_v13  ;;  %v376_v20 = vld [vmem:[%s484_s1] sm:$0xff]  }
   0x9   :  { %v298_v27 = vld [vmem:[%s486_s2] ss:$0 sm:$0xff] }
   0xb   :  { %330 = vmatpush3.bf16.msra.mxu0 %v365_v6  ;;  %355 = vmatmul.mubr.msk.bf16.vlgmr.msra.gmra.mxu1 %vm185_vm1, %v381_v17 }
   0xc   :  { %331 = vmatprep.subr.bf16.mxu0 %v366_v7 }
   0xf   :  { %332 = vmatpush3.bf16.msra.mxu0 %v367_v8 }
  0x10   :  { %333 = vmatprep.subr.bf16.mxu0 %v368_v9 }
  0x13   :  { %334 = vmatpush3.bf16.msra.mxu0 %v369_v11 }
  0x14   :  { %335 = vmatprep.subr.bf16.mxu0 %v370_v12 }
  0x17   :  { %336 = vmatpush3.bf16.msra.mxu0 %v371_v14 }
  0x18   :  { %337 = vmatprep.subr.bf16.mxu0 %v372_v16 }
  0x1b   :  { %338 = vmatpush3.bf16.msra.mxu0 %v373_v18 }
  0x1c   :  { %339 = vmatprep.subr.bf16.mxu0 %v375_v19 }
  0x1f   :  { %340 = vmatpush3.bf16.msra.mxu0 %v376_v20 }
  0x22   :  { %222 = vmatmul.mubr.bf16.vlgmr.msra.gmra.mxu0 %v378_v21 }
  0xcb   :  { %v264_v22 = vpop.f32.mrf.mxu1 }
  0xcd   :  { %v356_v23 = vpop.f32.mrf.mxu1 }
  0xcf   :  { %v267_v24 = vpop.f32.mrf.mxu1 }
  0xd1   :  { %v357_v25 = vpop.f32.mrf.mxu1 }
  0xe2   :  { %v341_v26 = vpop.f32.mrf.mxu0 }
  0xe4   :  { %v342_v28 = vpop.f32.mrf.mxu0 }
  0xe5   :  { %v343_v29 = vadd.f32 %v342_v28, %v341_v26 }
  0xe6   :  { %v344_v30 = vpop.f32.mrf.mxu0 }
  0xe7   :  { %v224_v31 = vadd.f32 %v343_v29, %v298_v27 }
  0xe8   :  { %v345_v32 = vpop.f32.mrf.mxu0 }
  0xe9   :  { %v265_v33 = vadd.f32 %v264_v22, %v224_v31  ;;  %v346_v34 = vadd.f32 %v345_v32, %v344_v30 }
  0xeb   :  { %v271_v35 = vsub.f32 0.0, %v265_v33  ;;  %v227_v36 = vadd.f32 %v346_v34, %v298_v27 }
  0xed   :  { %v273_v37 = vmul.f32 1.442695, %v271_v35  ;;  %v268_v38 = vadd.f32 %v267_v24, %v227_v36 }
  0xef   :  { %382 = vpow2.f32 %v273_v37  ;;  %v272_v39 = vsub.f32 0.0, %v268_v38 }
  0xf1   :  { %v275_v40 = vmul.f32 1.442695, %v272_v39 }
  0xf3   :  { %384 = vpow2.f32 %v275_v40 }
  0xfc   :  { %v383_v41 = vpop.eup %382 }
  0xfd   :  { %v277_v42 = vadd.f32 1.0, %v383_v41 }
  0xff   :  { %386 = vrcp.f32 %v277_v42 }
 0x100   :  { %v385_v43 = vpop.eup %384 }
 0x101   :  { %v278_v44 = vadd.f32 1.0, %v385_v43 }
 0x103   :  { %388 = vrcp.f32 %v278_v44 }
 0x10c   :  { %v387_v45 = vpop.eup %386 }
 0x10d   :  { %v281_v46 = vmul.f32 %v387_v45, %v265_v33 }
 0x10f   :  { %v323_v47 = vpack.c.bf16 %v281_v46, %v281_v46 }
 0x110   :  { %v389_v48 = vpop.eup %388 }
 0x111   :  { %292 = vst.msk [vmem:[%s487_s3] sm:$0xf] %vm291_vm2, %v323_v47  ;;  %v282_v49 = vmul.f32 %v389_v48, %v268_v38 }
 0x113   :  { %v324_v50 = vpack.c.bf16 %v282_v49, %v282_v49 }
 0x115   :  { %293 = vst.msk [vmem:[%s487_s3 + $0x4] sm:$0xf] %vm291_vm2, %v324_v50 }

// kernel: stmap_feature_extractor.8
= control target key start
LH: loop header
LB: loop body
LE: loop exit
PB: predicated region body
PF: predicated region fallthrough
CT: control target
= control target key end

     0   :  { %v660_v33 = vmov 0.0   ;;  %vm661_vm0 = vmmov 0   ;;  %vm341_vm1 = vcmask 523264   ;;  %s811_s1 = inlined_call_operand.vmem [shape: bf16[576,128], index: 1, kind: input, shape index: {}]   ;;  %s812_s0 = inlined_call_operand.vmem [shape: bf16[16,576], index: 0, kind: input, shape index: {}]   ;;  %s813_s2 = inlined_call_operand.vmem [shape: f32[1,128], index: 2, kind: input, shape index: {}]   ;;  %s814_s3 = inlined_call_operand.vmem [shape: bf16[16,128], index: 3, kind: output, shape index: {}]  }
   0x1   :  { %v609_v0 = vld [vmem:[%s811_s1 + $0x78] sm:$0xff]   ;;  %v613_v4 = vld [vmem:[%s811_s1 + $0x70] sm:$0xff]   ;;  %v617_v8 = vld [vmem:[%s811_s1 + $0x68] sm:$0xff]  }
   0x2   :  { %v610_v1 = vld [vmem:[%s811_s1 + $0x38] sm:$0xff]   ;;  %546 = vmatprep.subr.bf16.mxu0 %v609_v0  ;;  %v614_v5 = vld [vmem:[%s811_s1 + $0x30] sm:$0xff]   ;;  %v618_v9 = vld [vmem:[%s811_s1 + $0x28] sm:$0xff]  }
   0x3   :  { %v611_v2 = vld [vmem:[%s811_s1 + $0xf8] sm:$0xff]   ;;  %547 = vmatpush3.bf16.msra.mxu0 %v610_v1  ;;  %v615_v6 = vld [vmem:[%s811_s1 + $0xf0] sm:$0xff]   ;;  %v619_v10 = vld [vmem:[%s811_s1 + $0xe8] sm:$0xff]  }
   0x4   :  { %v612_v3 = vld [vmem:[%s811_s1 + $0xb8] sm:$0xff]   ;;  %568 = vmatprep.subr.bf16.mxu1 %v611_v2  ;;  %548 = vmatprep.subr.bf16.mxu0 %v613_v4  ;;  %v616_v7 = vld [vmem:[%s811_s1 + $0xb0] sm:$0xff]   ;;  %v620_v11 = vld [vmem:[%s811_s1 + $0xa8] sm:$0xff]  }
   0x5   :  { %569 = vmatpush3.bf16.msra.mxu1 %v612_v3  ;;  %v621_v12 = vld [vmem:[%s811_s1 + $0x60] sm:$0xff]   ;;  %v625_v16 = vld [vmem:[%s811_s1 + $0x58] sm:$0xff]   ;;  %v629_v20 = vld [vmem:[%s811_s1 + $0x50] sm:$0xff]  }
   0x6   :  { %570 = vmatprep.subr.bf16.mxu1 %v615_v6  ;;  %v622_v13 = vld [vmem:[%s811_s1 + $0x20] sm:$0xff]   ;;  %v626_v17 = vld [vmem:[%s811_s1 + $0x18] sm:$0xff]   ;;  %v630_v21 = vld [vmem:[%s811_s1 + $0x10] sm:$0xff]  }
   0x7   :  { %549 = vmatpush3.bf16.msra.mxu0 %v614_v5  ;;  %v623_v14 = vld [vmem:[%s811_s1 + $0xe0] sm:$0xff]   ;;  %v627_v18 = vld [vmem:[%s811_s1 + $0xd8] sm:$0xff]   ;;  %v631_v22 = vld [vmem:[%s811_s1 + $0xd0] sm:$0xff]  }
   0x8   :  { %550 = vmatprep.subr.bf16.mxu0 %v617_v8  ;;  %v624_v15 = vld [vmem:[%s811_s1 + $0xa0] sm:$0xff]   ;;  %v628_v19 = vld [vmem:[%s811_s1 + $0x98] sm:$0xff]   ;;  %v632_v23 = vld [vmem:[%s811_s1 + $0x90] sm:$0xff]  }
   0x9   :  { %571 = vmatpush3.bf16.msra.mxu1 %v616_v7  ;;  %v633_v24 = vld [vmem:[%s811_s1 + $0x48] sm:$0xff]   ;;  %v637_v28 = vld [vmem:[%s811_s1 + $0x40] sm:$0xff]   ;;  %v647_v37 = vld [vmem:[%s811_s1 + $0x118] sm:$0xff]  }
   0xa   :  { %572 = vmatprep.subr.bf16.mxu1 %v619_v10  ;;  %v634_v25 = vld [vmem:[%s811_s1 + $0x8] sm:$0xff]   ;;  %v638_v29 = vld [vmem:[%s811_s1] sm:$0xff]   ;;  %v648_v38 = vld [vmem:[%s811_s1 + $0x110] sm:$0xff]  }
   0xb   :  { %551 = vmatpush3.bf16.msra.mxu0 %v618_v9  ;;  %v635_v26 = vld [vmem:[%s811_s1 + $0xc8] sm:$0xff]   ;;  %v639_v30 = vld [vmem:[%s811_s1 + $0xc0] sm:$0xff]  }
   0xc   :  { %552 = vmatprep.subr.bf16.mxu0 %v621_v12  ;;  %v636_v27 = vld [vmem:[%s811_s1 + $0x88] sm:$0xff]   ;;  %v640_v31 = vld [vmem:[%s812_s0] ss:$20 sps:$4 sm:$0xff]   ;;  %v642_v32 = vld [vmem:[%s812_s0 + $0x4] ss:$20 sps:$4 sm:$0xff]  }
   0xd   :  { %573 = vmatpush3.bf16.msra.mxu1 %v620_v11  ;;  %v643_v34 = vld [vmem:[%s811_s1 + $0x80] sm:$0xff]   ;;  %377 = vmatprep.mubr.bf16.mxu0 %v642_v32  ;;  %v644_v35 = vld [vmem:[%s812_s0 + $0x8] ss:$20 sps:$4 sm:$0xff]  }
   0xe   :  { %574 = vmatprep.subr.bf16.mxu1 %v623_v14  ;;  %v646_v36 = vld [vmem:[%s812_s0 + $0xc] ss:$20 sps:$4 sm:$0xff]   ;;  %v651_v41 = vld [vmem:[%s812_s0 + $0x10] ss:$20 sps:$4 sm:$0xff]  }
   0xf   :  { %553 = vmatpush3.bf16.msra.mxu0 %v622_v13  ;;  %418 = vmatprep.mubr.bf16.mxu1 %v646_v36  ;;  %v649_v39 = vld [vmem:[%s811_s1 + $0x108] sm:$0xff]   ;;  %v650_v40 = vld [vmem:[%s811_s1 + $0x100] sm:$0xff]  }
  0x10   :  { %554 = vmatprep.subr.bf16.mxu0 %v625_v16  ;;  %v494_v48 = vld [vmem:[%s813_s2] ss:$0 sm:$0xff] }
  0x11   :  { %575 = vmatpush3.bf16.msra.mxu1 %v624_v15 }
  0x12   :  { %576 = vmatprep.subr.bf16.mxu1 %v627_v18 }
  0x13   :  { %555 = vmatpush3.bf16.msra.mxu0 %v626_v17 }
  0x14   :  { %556 = vmatprep.subr.bf16.mxu0 %v629_v20 }
  0x15   :  { %577 = vmatpush3.bf16.msra.mxu1 %v628_v19 }
  0x16   :  { %578 = vmatprep.subr.bf16.mxu1 %v631_v22 }
  0x17   :  { %557 = vmatpush3.bf16.msra.mxu0 %v630_v21 }
  0x18   :  { %558 = vmatprep.subr.bf16.mxu0 %v633_v24 }
  0x19   :  { %579 = vmatpush3.bf16.msra.mxu1 %v632_v23 }
  0x1a   :  { %580 = vmatprep.subr.bf16.mxu1 %v635_v26 }
  0x1b   :  { %559 = vmatpush3.bf16.msra.mxu0 %v634_v25 }
  0x1c   :  { %560 = vmatprep.subr.bf16.mxu0 %v637_v28 }
  0x1d   :  { %581 = vmatpush3.bf16.msra.mxu1 %v636_v27 }
  0x1e   :  { %582 = vmatprep.subr.bf16.mxu1 %v639_v30 }
  0x1f   :  { %561 = vmatpush3.bf16.msra.mxu0 %v638_v29 }
  0x20   :  { %595 = vmatprep.subr.bf16.mxu0 %v660_v33 }
  0x21   :  { %583 = vmatpush3.bf16.msra.mxu1 %v643_v34 }
  0x22   :  { %378 = vmatmul.mubr.bf16.vlgmr.msra.gmra.mxu0 %v640_v31 }
  0x23   :  { %603 = vmatprep.mubr.msk.bf16.mxu0 %vm661_vm0, %v660_v33  ;;  %596 = vmatpush3.bf16.msra.mxu0 %v647_v37 }
  0x24   :  { %419 = vmatmul.mubr.bf16.vlgmr.msra.gmra.mxu1 %v644_v35  ;;  %597 = vmatprep.subr.bf16.mxu0 %v660_v33 }
  0x27   :  { %598 = vmatpush3.bf16.msra.mxu0 %v648_v38 }
  0x28   :  { %599 = vmatprep.subr.bf16.mxu0 %v660_v33 }
  0x2b   :  { %600 = vmatpush3.bf16.msra.mxu0 %v649_v39 }
  0x2c   :  { %601 = vmatprep.subr.bf16.mxu0 %v660_v33 }
  0x2f   :  { %602 = vmatpush3.bf16.msra.mxu0 %v650_v40 }
  0x32   :  { %604 = vmatmul.mubr.msk.bf16.vlgmr.msra.gmra.mxu0 %vm341_vm1, %v651_v41 }
  0xe2   :  { %v562_v42 = vpop.f32.mrf.mxu0 }
  0xe4   :  { %v563_v43 = vpop.f32.mrf.mxu0  ;;  %v584_v44 = vpop.f32.mrf.mxu1 }
  0xe5   :  { %v564_v47 = vadd.f32 %v563_v43, %v562_v42 }
  0xe6   :  { %v565_v45 = vpop.f32.mrf.mxu0  ;;  %v585_v46 = vpop.f32.mrf.mxu1 }
  0xe7   :  { %v380_v51 = vadd.f32 %v564_v47, %v494_v48  ;;  %v586_v52 = vadd.f32 %v585_v46, %v584_v44 }
  0xe8   :  { %v566_v49 = vpop.f32.mrf.mxu0  ;;  %v587_v50 = vpop.f32.mrf.mxu1 }
  0xe9   :  { %v567_v53 = vadd.f32 %v566_v49, %v565_v45  ;;  %v421_v57 = vadd.f32 %v586_v52, %v380_v51 }
  0xea   :  { %v588_v54 = vpop.f32.mrf.mxu1 }
  0xeb   :  { %v383_v55 = vadd.f32 %v567_v53, %v494_v48  ;;  %v589_v56 = vadd.f32 %v588_v54, %v587_v50 }
  0xed   :  { %v424_v62 = vadd.f32 %v589_v56, %v383_v55 }
  0xf2   :  { %v461_v58 = vpop.f32.mrf.mxu0 }
  0xf3   :  { %v462_v59 = vadd.f32 %v461_v58, %v421_v57 }
  0xf4   :  { %v605_v60 = vpop.f32.mrf.mxu0 }
  0xf5   :  { %v468_v61 = vsub.f32 0.0, %v462_v59 }
  0xf6   :  { %v464_v63 = vpop.f32.mrf.mxu0 }
  0xf7   :  { %v470_v0 = vmul.f32 1.442695, %v468_v61  ;;  %v465_v1 = vadd.f32 %v464_v63, %v424_v62 }
  0xf8   :  { %v606_v2 = vpop.f32.mrf.mxu0 }
  0xf9   :  { %652 = vpow2.f32 %v470_v0  ;;  %v469_v3 = vsub.f32 0.0, %v465_v1 }
  0xfb   :  { %v472_v4 = vmul.f32 1.442695, %v469_v3 }
  0xfd   :  { %654 = vpow2.f32 %v472_v4 }
 0x106   :  { %v653_v5 = vpop.eup %652 }
 0x107   :  { %v474_v6 = vadd.f32 1.0, %v653_v5 }
 0x109   :  { %656 = vrcp.f32 %v474_v6 }
 0x10a   :  { %v655_v7 = vpop.eup %654 }
 0x10b   :  { %v475_v8 = vadd.f32 1.0, %v655_v7 }
 0x10d   :  { %658 = vrcp.f32 %v475_v8 }
 0x116   :  { %v657_v9 = vpop.eup %656 }
 0x117   :  { %v478_v11 = vmul.f32 %v657_v9, %v462_v59 }
 0x11a   :  { %v659_v10 = vpop.eup %658 }
 0x11b   :  { %v479_v12 = vmul.f32 %v659_v10, %v465_v1 }
 0x11d   :  { %v544_v13 = vpack.c.bf16 %v479_v12, %v478_v11 }
 0x11f   :  { %545 = vst [vmem:[%s814_s3] sm:$0xff] %v544_v13  }

// kernel: stmap_feature_extractor.9
= control target key start
LH: loop header
LB: loop body
LE: loop exit
PB: predicated region body
PF: predicated region fallthrough
CT: control target
= control target key end

     0   :  { %vm1175_vm0 = vmmov 0   ;;  %vm873_vm1 = vcmask 261120   ;;  %s1448_s1 = inlined_call_operand.vmem [shape: bf16[1152,32], index: 1, kind: input, shape index: {}]   ;;  %s1449_s0 = inlined_call_operand.vmem [shape: bf16[16,1152], index: 0, kind: input, shape index: {}]   ;;  %s1450_s2 = inlined_call_operand.vmem [shape: f32[1,32], index: 2, kind: input, shape index: {}]   ;;  %s1451_s3 = inlined_call_operand.vmem [shape: f32[16,32], index: 3, kind: output, shape index: {}]  }
   0x1   :  { %v1081_v0 = vld [vmem:[%s1448_s1 + $0x78] sm:$0xff]   ;;  %v1085_v4 = vld [vmem:[%s1448_s1 + $0x70] sm:$0xff]   ;;  %v1089_v8 = vld [vmem:[%s1448_s1 + $0x68] sm:$0xff]  }
   0x2   :  { %v1082_v1 = vld [vmem:[%s1448_s1 + $0x38] sm:$0xff]   ;;  %962 = vmatprep.subr.bf16.mxu0 %v1081_v0  ;;  %v1086_v5 = vld [vmem:[%s1448_s1 + $0x30] sm:$0xff]   ;;  %v1090_v9 = vld [vmem:[%s1448_s1 + $0x28] sm:$0xff]  }
   0x3   :  { %v1083_v2 = vld [vmem:[%s1448_s1 + $0xf8] sm:$0xff]   ;;  %963 = vmatpush3.bf16.msra.mxu0 %v1082_v1  ;;  %v1087_v6 = vld [vmem:[%s1448_s1 + $0xf0] sm:$0xff]   ;;  %v1091_v10 = vld [vmem:[%s1448_s1 + $0xe8] sm:$0xff]  }
   0x4   :  { %v1084_v3 = vld [vmem:[%s1448_s1 + $0xb8] sm:$0xff]   ;;  %984 = vmatprep.subr.bf16.mxu1 %v1083_v2  ;;  %964 = vmatprep.subr.bf16.mxu0 %v1085_v4  ;;  %v1088_v7 = vld [vmem:[%s1448_s1 + $0xb0] sm:$0xff]   ;;  %v1092_v11 = vld [vmem:[%s1448_s1 + $0xa8] sm:$0xff]  }
   0x5   :  { %985 = vmatpush3.bf16.msra.mxu1 %v1084_v3  ;;  %v1093_v12 = vld [vmem:[%s1448_s1 + $0x60] sm:$0xff]   ;;  %v1097_v16 = vld [vmem:[%s1448_s1 + $0x58] sm:$0xff]   ;;  %v1101_v20 = vld [vmem:[%s1448_s1 + $0x50] sm:$0xff]  }
   0x6   :  { %986 = vmatprep.subr.bf16.mxu1 %v1087_v6  ;;  %v1094_v13 = vld [vmem:[%s1448_s1 + $0x20] sm:$0xff]   ;;  %v1098_v17 = vld [vmem:[%s1448_s1 + $0x18] sm:$0xff]   ;;  %v1102_v21 = vld [vmem:[%s1448_s1 + $0x10] sm:$0xff]   ;;  %v1174_v6 = vmov 0.0  }
   0x7   :  { %965 = vmatpush3.bf16.msra.mxu0 %v1086_v5  ;;  %v1095_v14 = vld [vmem:[%s1448_s1 + $0xe0] sm:$0xff]   ;;  %v1099_v18 = vld [vmem:[%s1448_s1 + $0xd8] sm:$0xff]   ;;  %v1103_v22 = vld [vmem:[%s1448_s1 + $0xd0] sm:$0xff]  }
   0x8   :  { %966 = vmatprep.subr.bf16.mxu0 %v1089_v8  ;;  %v1096_v15 = vld [vmem:[%s1448_s1 + $0xa0] sm:$0xff]   ;;  %v1100_v19 = vld [vmem:[%s1448_s1 + $0x98] sm:$0xff]   ;;  %v1104_v23 = vld [vmem:[%s1448_s1 + $0x90] sm:$0xff]  }
   0x9   :  { %987 = vmatpush3.bf16.msra.mxu1 %v1088_v7  ;;  %v1105_v24 = vld [vmem:[%s1448_s1 + $0x48] sm:$0xff]   ;;  %v1109_v28 = vld [vmem:[%s1448_s1 + $0x40] sm:$0xff]   ;;  %v1116_v34 = vld [vmem:[%s1448_s1 + $0x178] sm:$0xff]  }
   0xa   :  { %988 = vmatprep.subr.bf16.mxu1 %v1091_v10  ;;  %v1106_v25 = vld [vmem:[%s1448_s1 + $0x8] sm:$0xff]   ;;  %v1110_v29 = vld [vmem:[%s1448_s1] sm:$0xff]   ;;  %v1120_v37 = vld [vmem:[%s1448_s1 + $0x138] sm:$0xff]  }
   0xb   :  { %967 = vmatpush3.bf16.msra.mxu0 %v1090_v9  ;;  %v1107_v26 = vld [vmem:[%s1448_s1 + $0xc8] sm:$0xff]   ;;  %v1111_v30 = vld [vmem:[%s1448_s1 + $0xc0] sm:$0xff]   ;;  %v1121_v38 = vld [vmem:[%s1448_s1 + $0x1f8] sm:$0xff]  }
   0xc   :  { %968 = vmatprep.subr.bf16.mxu0 %v1093_v12  ;;  %v1108_v27 = vld [vmem:[%s1448_s1 + $0x88] sm:$0xff]   ;;  %v1112_v31 = vld [vmem:[%s1449_s0] ss:$36 sps:$4 sm:$0xff]   ;;  %v1122_v39 = vld [vmem:[%s1448_s1 + $0x1b8] sm:$0xff]  }
   0xd   :  { %989 = vmatpush3.bf16.msra.mxu1 %v1092_v11  ;;  %v1114_v32 = vld [vmem:[%s1449_s0 + $0x4] ss:$36 sps:$4 sm:$0xff]   ;;  %v1119_v36 = vld [vmem:[%s1449_s0 + $0xc] ss:$36 sps:$4 sm:$0xff]   ;;  %v1135_v52 = vld [vmem:[%s1448_s1 + $0x158] sm:$0xff]  }
   0xe   :  { %990 = vmatprep.subr.bf16.mxu1 %v1095_v14  ;;  %v1115_v33 = vld [vmem:[%s1448_s1 + $0x80] sm:$0xff]   ;;  %686 = vmatprep.mubr.bf16.mxu0 %v1114_v32  ;;  %v1117_v35 = vld [vmem:[%s1449_s0 + $0x8] ss:$36 sps:$4 sm:$0xff]   ;;  %v1123_v40 = vld [vmem:[%s1448_s1 + $0x170] sm:$0xff]  }
   0xf   :  { %969 = vmatpush3.bf16.msra.mxu0 %v1094_v13  ;;  %727 = vmatprep.mubr.bf16.mxu1 %v1119_v36  ;;  %v1124_v41 = vld [vmem:[%s1448_s1 + $0x130] sm:$0xff]   ;;  %v1127_v44 = vld [vmem:[%s1448_s1 + $0x168] sm:$0xff]   ;;  %v1131_v48 = vld [vmem:[%s1448_s1 + $0x160] sm:$0xff]  }
  0x10   :  { %970 = vmatprep.subr.bf16.mxu0 %v1097_v16  ;;  %v1125_v42 = vld [vmem:[%s1448_s1 + $0x1f0] sm:$0xff]   ;;  %v1128_v45 = vld [vmem:[%s1448_s1 + $0x128] sm:$0xff]   ;;  %v1132_v49 = vld [vmem:[%s1448_s1 + $0x120] sm:$0xff]  }
  0x11   :  { %991 = vmatpush3.bf16.msra.mxu1 %v1096_v15  ;;  %v1126_v43 = vld [vmem:[%s1448_s1 + $0x1b0] sm:$0xff]   ;;  %v1129_v46 = vld [vmem:[%s1448_s1 + $0x1e8] sm:$0xff]   ;;  %v1133_v50 = vld [vmem:[%s1448_s1 + $0x1e0] sm:$0xff]  }
  0x12   :  { %992 = vmatprep.subr.bf16.mxu1 %v1099_v18  ;;  %v1130_v47 = vld [vmem:[%s1448_s1 + $0x1a8] sm:$0xff]   ;;  %v1134_v51 = vld [vmem:[%s1448_s1 + $0x1a0] sm:$0xff]   ;;  %v1136_v53 = vld [vmem:[%s1448_s1 + $0x118] sm:$0xff]  }
  0x13   :  { %971 = vmatpush3.bf16.msra.mxu0 %v1098_v17  ;;  %v1137_v54 = vld [vmem:[%s1448_s1 + $0x1d8] sm:$0xff]   ;;  %v1139_v56 = vld [vmem:[%s1448_s1 + $0x150] sm:$0xff]   ;;  %v1143_v60 = vld [vmem:[%s1448_s1 + $0x148] sm:$0xff]  }
  0x14   :  { %972 = vmatprep.subr.bf16.mxu0 %v1101_v20  ;;  %v1138_v55 = vld [vmem:[%s1448_s1 + $0x198] sm:$0xff]   ;;  %v1140_v57 = vld [vmem:[%s1448_s1 + $0x110] sm:$0xff]   ;;  %v1144_v61 = vld [vmem:[%s1448_s1 + $0x108] sm:$0xff]  }
  0x15   :  { %993 = vmatpush3.bf16.msra.mxu1 %v1100_v19  ;;  %v1141_v58 = vld [vmem:[%s1448_s1 + $0x1d0] sm:$0xff]   ;;  %v1145_v62 = vld [vmem:[%s1448_s1 + $0x1c8] sm:$0xff]   ;;  %v1147_v0 = vld [vmem:[%s1448_s1 + $0x140] sm:$0xff]  }
  0x16   :  { %994 = vmatprep.subr.bf16.mxu1 %v1103_v22  ;;  %v1142_v59 = vld [vmem:[%s1448_s1 + $0x190] sm:$0xff]   ;;  %v1146_v63 = vld [vmem:[%s1448_s1 + $0x188] sm:$0xff]   ;;  %v1148_v1 = vld [vmem:[%s1448_s1 + $0x100] sm:$0xff]  }
  0x17   :  { %973 = vmatpush3.bf16.msra.mxu0 %v1102_v21  ;;  %v1149_v2 = vld [vmem:[%s1448_s1 + $0x1c0] sm:$0xff]   ;;  %v1150_v3 = vld [vmem:[%s1449_s0 + $0x10] ss:$36 sps:$4 sm:$0xff]   ;;  %v1154_v7 = vld [vmem:[%s1449_s0 + $0x18] ss:$36 sps:$4 sm:$0xff]  }
  0x18   :  { %974 = vmatprep.subr.bf16.mxu0 %v1105_v24  ;;  %v1152_v4 = vld [vmem:[%s1449_s0 + $0x14] ss:$36 sps:$4 sm:$0xff]   ;;  %v1153_v5 = vld [vmem:[%s1448_s1 + $0x180] sm:$0xff]   ;;  %v1159_v11 = vld [vmem:[%s1448_s1 + $0x228] sm:$0xff]  }
  0x19   :  { %995 = vmatpush3.bf16.msra.mxu1 %v1104_v23  ;;  %v1156_v8 = vld [vmem:[%s1449_s0 + $0x1c] ss:$36 sps:$4 sm:$0xff]   ;;  %v1158_v10 = vld [vmem:[%s1448_s1 + $0x230] sm:$0xff]   ;;  %v1163_v15 = vld [vmem:[%s1448_s1 + $0x208] sm:$0xff]  }
  0x1a   :  { %996 = vmatprep.subr.bf16.mxu1 %v1107_v26  ;;  %v1157_v9 = vld [vmem:[%s1448_s1 + $0x238] sm:$0xff]   ;;  %v1160_v12 = vld [vmem:[%s1448_s1 + $0x220] sm:$0xff]   ;;  %v1162_v14 = vld [vmem:[%s1448_s1 + $0x210] sm:$0xff]  }
  0x1b   :  { %975 = vmatpush3.bf16.msra.mxu0 %v1106_v25  ;;  %v1161_v13 = vld [vmem:[%s1448_s1 + $0x218] sm:$0xff]   ;;  %v1164_v16 = vld [vmem:[%s1448_s1 + $0x200] sm:$0xff]  }
  0x1c   :  { %976 = vmatprep.subr.bf16.mxu0 %v1109_v28  ;;  %v1165_v17 = vld [vmem:[%s1449_s0 + $0x20] ss:$36 sps:$4 sm:$0xff]  }
  0x1d   :  { %997 = vmatpush3.bf16.msra.mxu1 %v1108_v27 }
  0x1e   :  { %998 = vmatprep.subr.bf16.mxu1 %v1111_v30  ;;  %v880_v30 = vld [vmem:[%s1450_s2] ss:$0 sm:$0xff] }
  0x1f   :  { %977 = vmatpush3.bf16.msra.mxu0 %v1110_v29 }
  0x20   :  { %1006 = vmatprep.subr.bf16.mxu0 %v1116_v34 }
  0x21   :  { %999 = vmatpush3.bf16.msra.mxu1 %v1115_v33 }
  0x22   :  { %687 = vmatmul.mubr.bf16.vlgmr.msra.gmra.mxu0 %v1112_v31  ;;  %1028 = vmatprep.subr.bf16.mxu1 %v1121_v38 }
  0x23   :  { %1007 = vmatpush3.bf16.msra.mxu0 %v1120_v37  ;;  %768 = vmatprep.mubr.bf16.mxu0 %v1152_v4 }
  0x24   :  { %728 = vmatmul.mubr.bf16.vlgmr.msra.gmra.mxu1 %v1117_v35  ;;  %1008 = vmatprep.subr.bf16.mxu0 %v1123_v40 }
  0x25   :  { %1029 = vmatpush3.bf16.msra.mxu1 %v1122_v39  ;;  %809 = vmatprep.mubr.bf16.mxu1 %v1156_v8 }
  0x26   :  { %1030 = vmatprep.subr.bf16.mxu1 %v1125_v42 }
  0x27   :  { %1009 = vmatpush3.bf16.msra.mxu0 %v1124_v41 }
  0x28   :  { %1010 = vmatprep.subr.bf16.mxu0 %v1127_v44 }
  0x29   :  { %1031 = vmatpush3.bf16.msra.mxu1 %v1126_v43 }
  0x2a   :  { %1032 = vmatprep.subr.bf16.mxu1 %v1129_v46 }
  0x2b   :  { %1011 = vmatpush3.bf16.msra.mxu0 %v1128_v45 }
  0x2c   :  { %1012 = vmatprep.subr.bf16.mxu0 %v1131_v48 }
  0x2d   :  { %1033 = vmatpush3.bf16.msra.mxu1 %v1130_v47 }
  0x2e   :  { %1034 = vmatprep.subr.bf16.mxu1 %v1133_v50 }
  0x2f   :  { %1013 = vmatpush3.bf16.msra.mxu0 %v1132_v49 }
  0x30   :  { %1014 = vmatprep.subr.bf16.mxu0 %v1135_v52 }
  0x31   :  { %1035 = vmatpush3.bf16.msra.mxu1 %v1134_v51 }
  0x32   :  { %1036 = vmatprep.subr.bf16.mxu1 %v1137_v54 }
  0x33   :  { %1015 = vmatpush3.bf16.msra.mxu0 %v1136_v53 }
  0x34   :  { %1016 = vmatprep.subr.bf16.mxu0 %v1139_v56 }
  0x35   :  { %1037 = vmatpush3.bf16.msra.mxu1 %v1138_v55 }
  0x36   :  { %1038 = vmatprep.subr.bf16.mxu1 %v1141_v58 }
  0x37   :  { %1017 = vmatpush3.bf16.msra.mxu0 %v1140_v57 }
  0x38   :  { %1018 = vmatprep.subr.bf16.mxu0 %v1143_v60 }
  0x39   :  { %1039 = vmatpush3.bf16.msra.mxu1 %v1142_v59 }
  0x3a   :  { %1040 = vmatprep.subr.bf16.mxu1 %v1145_v62 }
  0x3b   :  { %1019 = vmatpush3.bf16.msra.mxu0 %v1144_v61 }
  0x3c   :  { %1020 = vmatprep.subr.bf16.mxu0 %v1147_v0 }
  0x3d   :  { %1041 = vmatpush3.bf16.msra.mxu1 %v1146_v63 }
  0x3e   :  { %1042 = vmatprep.subr.bf16.mxu1 %v1149_v2 }
  0x3f   :  { %1021 = vmatpush3.bf16.msra.mxu0 %v1148_v1 }
  0x40   :  { %1059 = vmatprep.subr.bf16.mxu0 %v1174_v6 }
  0x41   :  { %1043 = vmatpush3.bf16.msra.mxu1 %v1153_v5 }
  0x42   :  { %769 = vmatmul.mubr.bf16.vlgmr.msra.gmra.mxu0 %v1150_v3 }
  0x43   :  { %1075 = vmatprep.mubr.msk.bf16.mxu0 %vm1175_vm0, %v1174_v6  ;;  %1060 = vmatpush3.bf16.msra.mxu0 %v1157_v9 }
  0x44   :  { %810 = vmatmul.mubr.bf16.vlgmr.msra.gmra.mxu1 %v1154_v7  ;;  %1061 = vmatprep.subr.bf16.mxu0 %v1174_v6 }
  0x47   :  { %1062 = vmatpush3.bf16.msra.mxu0 %v1158_v10 }
  0x48   :  { %1063 = vmatprep.subr.bf16.mxu0 %v1174_v6 }
  0x4b   :  { %1064 = vmatpush3.bf16.msra.mxu0 %v1159_v11 }
  0x4c   :  { %1065 = vmatprep.subr.bf16.mxu0 %v1174_v6 }
  0x4f   :  { %1066 = vmatpush3.bf16.msra.mxu0 %v1160_v12 }
  0x50   :  { %1067 = vmatprep.subr.bf16.mxu0 %v1174_v6 }
  0x53   :  { %1068 = vmatpush3.bf16.msra.mxu0 %v1161_v13 }
  0x54   :  { %1069 = vmatprep.subr.bf16.mxu0 %v1174_v6 }
  0x57   :  { %1070 = vmatpush3.bf16.msra.mxu0 %v1162_v14 }
  0x58   :  { %1071 = vmatprep.subr.bf16.mxu0 %v1174_v6 }
  0x5b   :  { %1072 = vmatpush3.bf16.msra.mxu0 %v1163_v15 }
  0x5c   :  { %1073 = vmatprep.subr.bf16.mxu0 %v1174_v6 }
  0x5f   :  { %1074 = vmatpush3.bf16.msra.mxu0 %v1164_v16 }
  0x62   :  { %1076 = vmatmul.mubr.bf16.vlgmr.msra.gmra.mxu0 %v1165_v17 }
  0xe2   :  { %v978_v18 = vpop.f32.mrf.mxu0 }
  0xe4   :  { %v979_v19 = vpop.f32.mrf.mxu0  ;;  %v1000_v20 = vpop.f32.mrf.mxu1 }
  0xe5   :  { %v980_v29 = vadd.f32 %v979_v19, %v978_v18 }
  0xe6   :  { %v981_v21 = vpop.f32.mrf.mxu0  ;;  %v1001_v22 = vpop.f32.mrf.mxu1 }
  0xe7   :  { %v689_v33 = vadd.f32 %v980_v29, %v880_v30  ;;  %v1002_v34 = vadd.f32 %v1001_v22, %v1000_v20 }
  0xe8   :  { %v982_v23 = vpop.f32.mrf.mxu0  ;;  %v1003_v24 = vpop.f32.mrf.mxu1 }
  0xe9   :  { %v983_v35 = vadd.f32 %v982_v23, %v981_v21  ;;  %v730_v39 = vadd.f32 %v1002_v34, %v689_v33 }
  0xea   :  { %v1004_v26 = vpop.f32.mrf.mxu1 }
  0xeb   :  { %v692_v40 = vadd.f32 %v983_v35, %v880_v30  ;;  %v1005_v41 = vadd.f32 %v1004_v26, %v1003_v24 }
  0xed   :  { %v733_v46 = vadd.f32 %v1005_v41, %v692_v40 }
 0x102   :  { %v1022_v25 = vpop.f32.mrf.mxu0 }
 0x104   :  { %v1023_v27 = vpop.f32.mrf.mxu0  ;;  %v1044_v28 = vpop.f32.mrf.mxu1 }
 0x105   :  { %v1024_v36 = vadd.f32 %v1023_v27, %v1022_v25 }
 0x106   :  { %v1025_v31 = vpop.f32.mrf.mxu0  ;;  %v1045_v32 = vpop.f32.mrf.mxu1 }
 0x107   :  { %v771_v42 = vadd.f32 %v1024_v36, %v730_v39  ;;  %v1046_v43 = vadd.f32 %v1045_v32, %v1044_v28 }
 0x108   :  { %v1026_v37 = vpop.f32.mrf.mxu0  ;;  %v1047_v38 = vpop.f32.mrf.mxu1 }
 0x109   :  { %v1027_v44 = vadd.f32 %v1026_v37, %v1025_v31  ;;  %v812_v49 = vadd.f32 %v1046_v43, %v771_v42 }
 0x10a   :  { %v1048_v45 = vpop.f32.mrf.mxu1 }
 0x10b   :  { %v774_v47 = vadd.f32 %v1027_v44, %v733_v46  ;;  %v1049_v48 = vadd.f32 %v1048_v45, %v1047_v38 }
 0x10d   :  { %v815_v54 = vadd.f32 %v1049_v48, %v774_v47 }
 0x122   :  { %v852_v50 = vpop.f32.mrf.mxu0 }
 0x123   :  { %v853_v51 = vadd.f32 %v852_v50, %v812_v49 }
 0x124   :  { %v1077_v52 = vpop.f32.mrf.mxu0 }
 0x125   :  { %v859_v53 = vsub.f32 0.0, %v853_v51 }
 0x126   :  { %v855_v55 = vpop.f32.mrf.mxu0 }
 0x127   :  { %v861_v56 = vmul.f32 1.442695, %v859_v53  ;;  %v856_v57 = vadd.f32 %v855_v55, %v815_v54 }
 0x128   :  { %v1078_v58 = vpop.f32.mrf.mxu0 }
 0x129   :  { %1166 = vpow2.f32 %v861_v56  ;;  %v860_v59 = vsub.f32 0.0, %v856_v57 }
 0x12b   :  { %v863_v60 = vmul.f32 1.442695, %v860_v59 }
 0x12d   :  { %1168 = vpow2.f32 %v863_v60 }
 0x136   :  { %v1167_v61 = vpop.eup %1166 }
 0x137   :  { %v865_v62 = vadd.f32 1.0, %v1167_v61 }
 0x139   :  { %1170 = vrcp.f32 %v865_v62 }
 0x13a   :  { %v1169_v63 = vpop.eup %1168 }
 0x13b   :  { %v866_v0 = vadd.f32 1.0, %v1169_v63 }
 0x13d   :  { %1172 = vrcp.f32 %v866_v0 }
 0x146   :  { %v1171_v1 = vpop.eup %1170 }
 0x147   :  { %v871_v2 = vmul.f32 %v1171_v1, %v853_v51 }
 0x149   :  { %874 = vst.msk [vmem:[%s1451_s3] sm:$0xff] %vm873_vm1, %v871_v2 }
 0x14a   :  { %v1173_v3 = vpop.eup %1172 }
 0x14b   :  { %v872_v4 = vmul.f32 %v1173_v3, %v856_v57 }
 0x14d   :  { %875 = vst.msk [vmem:[%s1451_s3 + $0x8] sm:$0xff] %vm873_vm1, %v872_v4 }

</bundles_post_ra>
